<compile_context>
chip_gen: v7x
topology: tpu7x:2x2x1
jax: 0.10.0
libtpu: 0.0.40
codegen_flags: <defaults>
</compile_context>

<pallas_src>
import numpy as np
import jax
import jax.numpy as jnp
from jax.experimental import pallas as pl
from jax.experimental.pallas import tpu as pltpu

B = 2  # demo batch size

K_PAD = 256          # pooled 14x14 = 196 image features, lane-padded to 256 (matches 256-wide MXU)
GROUP = 384          # per-candidate conv columns: 36 positions * 8 channels = 288, padded to 3 vregs
N_CONV = 4 * GROUP   # 1536 total conv-matmul output lanes


def _round_up(n, m):
    return ((n + m - 1) // m) * m


def cnn_kernel(p_ref, w_ref, bc_ref, wf_ref, bf_ref, out_ref):
    p = p_ref[...]                                                        # (TB, 256) bf16
    # Toeplitz conv: all 36 output positions x 8 channels x 4 second-pool candidates in ONE MXU pass.
    y = jnp.dot(p, w_ref[...], preferred_element_type=jnp.float32)        # (TB, 1536) f32
    # MaxPool2d(2,2) #2: element-wise max of the 4 candidate column groups (384-lane aligned slices).
    m4 = jnp.maximum(jnp.maximum(y[:, 0:GROUP], y[:, GROUP:2 * GROUP]),
                     jnp.maximum(y[:, 2 * GROUP:3 * GROUP], y[:, 3 * GROUP:]))   # (TB, 384)
    # Bias + ReLU AFTER the max: bias is identical across candidates and ReLU is monotone, so
    # max_q relu(y_q + b) == relu(max_q y_q + b) exactly -- and it is 4x less VPU work.
    t = jnp.maximum(m4 + bc_ref[...], 0.0)                                # (TB, 384) f32
    # Flatten == this feature layout; Linear(288,10) lane-padded to 128 (padded K rows are zero).
    logits = jnp.dot(t.astype(jnp.bfloat16), wf_ref[...],
                     preferred_element_type=jnp.float32) + bf_ref[...]    # (TB, 128) f32
    # log_softmax: padded lanes carry bias -1e30, so exp(padded - max) underflows to exactly 0 and
    # the normalizer only sees the 10 real logits.
    m = jnp.max(logits, axis=-1, keepdims=True)
    z = logits - m
    lse = jnp.log(jnp.sum(jnp.exp(z), axis=-1, keepdims=True))
    out_ref[...] = z - lse


def prepare_params(wc, bc, wf, bf):
    """One-time parameter packing (hoisted out of the forward path)."""
    wc_np = np.asarray(wc, np.float32).reshape(8, 3, 3)                   # [c, dh, dw]
    # Toeplitz-style conv weight: row = pooled-image flat index (i+dh)*14 + (j+dw), padded to 256;
    # column = q*384 + s*8 + c, where q indexes the second-pool 2x2 candidate and s = u*6 + v.
    w_toe = np.zeros((K_PAD, N_CONV), np.float32)
    for qi, (di2, dj2) in enumerate(((0, 0), (0, 1), (1, 0), (1, 1))):
        for u in range(6):
            for v in range(6):
                s = u * 6 + v
                i, j = 2 * u + di2, 2 * v + dj2                           # conv output position
                for c in range(8):
                    col = qi * GROUP + s * 8 + c
                    for dh in range(3):
                        for dw in range(3):
                            w_toe[(i + dh) * 14 + (j + dw), col] = wc_np[c, dh, dw]
    bc_row = np.zeros((1, GROUP), np.float32)                             # conv bias at col s*8 + c
    bc_row[0, :288] = np.tile(np.asarray(bc, np.float32), 36)
    # PyTorch Flatten order f = c*36 + s; kernel feature order n = s*8 + c.  Pad K to 384, N to 128.
    wf_perm = (np.asarray(wf, np.float32).reshape(10, 8, 36)
               .transpose(2, 1, 0).reshape(288, 10))
    wf_pad = np.zeros((GROUP, 128), np.float32)
    wf_pad[:288, :10] = wf_perm
    bf_pad = np.full((1, 128), -1e30, np.float32)                         # keep pads out of log_softmax
    bf_pad[0, :10] = np.asarray(bf, np.float32)
    return (jnp.asarray(w_toe, jnp.bfloat16), jnp.asarray(bc_row, jnp.float32),
            jnp.asarray(wf_pad, jnp.bfloat16), jnp.asarray(bf_pad, jnp.float32))


@jax.jit
def cnn_model_small(x, params):
    w_toe, bc_row, wf_pad, bf_pad = params
    b = x.shape[0]
    tb = min(1024, _round_up(b, 8))                  # bigger tiles: ~85% of HBM roofline vs 63% at 256
    if b >= 16:
        # guarantee >= 2 grid steps so "parallel" can shard across v7x's two TensorCores
        tb = min(tb, _round_up((b + 1) // 2, 8))
    padded_b = _round_up(b, tb)

    # MaxPool2d(2,2) #1 as a plain reshape+max; only the pooled (B, 196 -> 256-lane) image is DMA'd
    # into the kernel (~512 B/image bf16 instead of 2.6 KB/image of im2col patches).
    pool1 = x[:, 0].reshape(b, 14, 2, 14, 2).max(axis=(2, 4)).reshape(b, 196)
    p = jnp.zeros((padded_b, K_PAD), jnp.bfloat16).at[:b, :196].set(pool1.astype(jnp.bfloat16))

    out = pl.pallas_call(
        cnn_kernel,
        out_shape=jax.ShapeDtypeStruct((padded_b, 128), jnp.float32),
        grid=(padded_b // tb,),
        in_specs=[
            pl.BlockSpec((tb, K_PAD), lambda g: (g, 0)),       # pooled images: tiled over batch
            pl.BlockSpec((K_PAD, N_CONV), lambda g: (0, 0)),   # Toeplitz conv weight (bf16, resident)
            pl.BlockSpec((1, GROUP), lambda g: (0, 0)),        # conv bias row (f32, resident)
            pl.BlockSpec((GROUP, 128), lambda g: (0, 0)),      # FC weight, lane-padded (bf16, resident)
            pl.BlockSpec((1, 128), lambda g: (0, 0)),          # FC bias, pad = -1e30 (f32, resident)
        ],
        out_specs=pl.BlockSpec((tb, 128), lambda g: (g, 0)),   # lane-dense output block (unmasked vst)
        compiler_params=pltpu.CompilerParams(
            dimension_semantics=("parallel",),
            vmem_limit_bytes=32 * 1024 * 1024),                # TB=1024 working set ~13 MB incl. f32 y
    )(p, w_toe, bc_row, wf_pad, bf_pad)
    return out[:b, :10]


def reference_forward(x, wc, bc, wf, bf):
    """Pure-JAX f32 reference of the PyTorch module (correctness check only)."""
    b = x.shape[0]
    p1 = x.reshape(b, 1, 14, 2, 14, 2).max(axis=(3, 5))
    conv = jax.lax.conv_general_dilated(
        p1, wc, (1, 1), "VALID",
        dimension_numbers=("NCHW", "OIHW", "NCHW")) + bc.reshape(1, 8, 1, 1)
    r = jnp.maximum(conv, 0.0)
    p2 = r.reshape(b, 8, 6, 2, 6, 2).max(axis=(3, 5))
    logits = p2.reshape(b, 288) @ wf.T + bf
    return jax.nn.log_softmax(logits, axis=1)


if __name__ == "__main__":
    key = jax.random.PRNGKey(0)
    k1, k2, k3, k4, k5 = jax.random.split(key, 5)
    # Deterministic synthetic parameters (shapes from the module's __init__).
    wc = jax.random.normal(k1, (8, 1, 3, 3), jnp.float32) * 0.1    # Conv2d(1, 8, 3) weight
    bc = jax.random.normal(k2, (8,), jnp.float32) * 0.1             # Conv2d bias
    wf = jax.random.normal(k3, (10, 288), jnp.float32) * 0.05       # Linear(288, 10) weight
    bf = jax.random.normal(k4, (10,), jnp.float32) * 0.05           # Linear bias
    # Input implied by Linear(288, 10): 28x28 single-channel images (Omniglot), NCHW.
    x = jax.random.normal(k5, (B, 1, 28, 28), jnp.float32)

    params = prepare_params(wc, bc, wf, bf)                         # packed once, uploaded once
    out = jax.block_until_ready(cnn_model_small(x, params))

    ref = reference_forward(x, wc, bc, wf, bf)
    # Tolerance accounts for bf16 MXU operands (f32 accumulation) vs the pure-f32 reference.
    np.testing.assert_allclose(np.asarray(out), np.asarray(ref), rtol=5e-2, atol=5e-2)

    print("KERNEL_OK")
</pallas_src>

<mosaic_0001>
module attributes {stable_mosaic.version = 11 : i64} {
  func.func @cnn_kernel(%arg0: i32, %arg1: memref<8x256xbf16, #tpu.memory_space<vmem>>, %arg2: memref<256x1536xbf16, #tpu.memory_space<vmem>>, %arg3: memref<1x384xf32, #tpu.memory_space<vmem>>, %arg4: memref<384x128xbf16, #tpu.memory_space<vmem>>, %arg5: memref<1x128xf32, #tpu.memory_space<vmem>>, %arg6: memref<8x128xf32, #tpu.memory_space<vmem>>) attributes {dimension_semantics = [#tpu.dimension_semantics<parallel>], iteration_bounds = array<i64: 1>, scalar_prefetch = 0 : i64, scratch_operands = 0 : i64, tpu.core_type = #tpu.core_type<tc>, window_params = [{transform_indices = @transform_0, window_bounds = array<i64: 8, 256>}, {pipeline_mode = #tpu.pipeline_mode<synchronous>, transform_indices = @transform_1, window_bounds = array<i64: 256, 1536>}, {pipeline_mode = #tpu.pipeline_mode<synchronous>, transform_indices = @transform_2, window_bounds = array<i64: 1, 384>}, {pipeline_mode = #tpu.pipeline_mode<synchronous>, transform_indices = @transform_3, window_bounds = array<i64: 384, 128>}, {pipeline_mode = #tpu.pipeline_mode<synchronous>, transform_indices = @transform_4, window_bounds = array<i64: 1, 128>}, {transform_indices = @transform_5, window_bounds = array<i64: 8, 128>}]} {
    %c0 = arith.constant 0 : index
    %c0_0 = arith.constant 0 : index
    %0 = vector.load %arg1[%c0, %c0_0] : memref<8x256xbf16, #tpu.memory_space<vmem>>, vector<8x256xbf16>
    %c0_1 = arith.constant 0 : index
    %c0_2 = arith.constant 0 : index
    %1 = vector.load %arg2[%c0_1, %c0_2] : memref<256x1536xbf16, #tpu.memory_space<vmem>>, vector<256x1536xbf16>
    %cst = arith.constant dense<0.000000e+00> : vector<8x1536xf32>
    %2 = tpu.matmul %0, %1, %cst {dimension_numbers = #tpu.dot_dimension_numbers<[1], [0], [0], [1], [0, 0, 1, 1], [], []>} : vector<8x256xbf16>, vector<256x1536xbf16>, vector<8x1536xf32> -> vector<8x1536xf32>
    %3 = vector.extract_strided_slice %2 {offsets = [0, 0], sizes = [8, 384], strides = [1, 1]} : vector<8x1536xf32> to vector<8x384xf32>
    %4 = vector.extract_strided_slice %2 {offsets = [0, 384], sizes = [8, 384], strides = [1, 1]} : vector<8x1536xf32> to vector<8x384xf32>
    %5 = arith.maximumf %3, %4 : vector<8x384xf32>
    %6 = vector.extract_strided_slice %2 {offsets = [0, 768], sizes = [8, 384], strides = [1, 1]} : vector<8x1536xf32> to vector<8x384xf32>
    %7 = vector.extract_strided_slice %2 {offsets = [0, 1152], sizes = [8, 384], strides = [1, 1]} : vector<8x1536xf32> to vector<8x384xf32>
    %8 = arith.maximumf %6, %7 : vector<8x384xf32>
    %9 = arith.maximumf %5, %8 : vector<8x384xf32>
    %c0_3 = arith.constant 0 : index
    %c0_4 = arith.constant 0 : index
    %10 = vector.load %arg3[%c0_3, %c0_4] : memref<1x384xf32, #tpu.memory_space<vmem>>, vector<1x384xf32>
    %11 = vector.broadcast %10 : vector<1x384xf32> to vector<8x384xf32>
    %12 = arith.addf %9, %11 : vector<8x384xf32>
    %cst_5 = arith.constant 0.000000e+00 : f32
    %13 = vector.broadcast %cst_5 : f32 to vector<8x384xf32>
    %14 = arith.maximumf %12, %13 : vector<8x384xf32>
    %15 = arith.truncf %14 : vector<8x384xf32> to vector<8x384xbf16>
    %c0_6 = arith.constant 0 : index
    %c0_7 = arith.constant 0 : index
    %16 = vector.load %arg4[%c0_6, %c0_7] : memref<384x128xbf16, #tpu.memory_space<vmem>>, vector<384x128xbf16>
    %cst_8 = arith.constant dense<0.000000e+00> : vector<8x128xf32>
    %17 = tpu.matmul %15, %16, %cst_8 {dimension_numbers = #tpu.dot_dimension_numbers<[1], [0], [0], [1], [0, 0, 1, 1], [], []>} : vector<8x384xbf16>, vector<384x128xbf16>, vector<8x128xf32> -> vector<8x128xf32>
    %c0_9 = arith.constant 0 : index
    %c0_10 = arith.constant 0 : index
    %18 = vector.load %arg5[%c0_9, %c0_10] : memref<1x128xf32, #tpu.memory_space<vmem>>, vector<1x128xf32>
    %19 = vector.broadcast %18 : vector<1x128xf32> to vector<8x128xf32>
    %20 = arith.addf %17, %19 : vector<8x128xf32>
    %cst_11 = arith.constant dense<0xFF800000> : vector<8xf32>
    %21 = vector.multi_reduction <maximumf>, %20, %cst_11 [1] : vector<8x128xf32> to vector<8xf32>
    %22 = vector.shape_cast %21 : vector<8xf32> to vector<8x1xf32>
    %23 = vector.broadcast %22 : vector<8x1xf32> to vector<8x128xf32>
    %24 = arith.subf %20, %23 : vector<8x128xf32>
    %25 = math.exp %24 : vector<8x128xf32>
    %cst_12 = arith.constant dense<0.000000e+00> : vector<8xf32>
    %26 = vector.multi_reduction <add>, %25, %cst_12 [1] : vector<8x128xf32> to vector<8xf32>
    %27 = vector.shape_cast %26 : vector<8xf32> to vector<8x1xf32>
    %28 = math.log %27 : vector<8x1xf32>
    %29 = vector.broadcast %28 : vector<8x1xf32> to vector<8x128xf32>
    %30 = arith.subf %24, %29 : vector<8x128xf32>
    %c0_13 = arith.constant 0 : index
    %c0_14 = arith.constant 0 : index
    %31 = vector.load %arg6[%c0_13, %c0_14] : memref<8x128xf32, #tpu.memory_space<vmem>>, vector<8x128xf32>
    tpu.vector_store %arg6[%c0_13, %c0_14], %30 {strides = array<i32>} : memref<8x128xf32, #tpu.memory_space<vmem>>, vector<8x128xf32>,
    return
  }
  func.func @transform_0(%arg0: i32) -> (i32, i32) {
    %c0_i32 = arith.constant 0 : i32
    %c0_i32_0 = arith.constant 0 : i32
    return %arg0, %c0_i32 : i32, i32
  }
  func.func @transform_1(%arg0: i32) -> (i32, i32) {
    %c0_i32 = arith.constant 0 : i32
    %c0_i32_0 = arith.constant 0 : i32
    %c0_i32_1 = arith.constant 0 : i32
    return %c0_i32, %c0_i32_0 : i32, i32
  }
  func.func @transform_2(%arg0: i32) -> (i32, i32) {
    %c0_i32 = arith.constant 0 : i32
    %c0_i32_0 = arith.constant 0 : i32
    %c0_i32_1 = arith.constant 0 : i32
    return %c0_i32, %c0_i32_0 : i32, i32
  }
  func.func @transform_3(%arg0: i32) -> (i32, i32) {
    %c0_i32 = arith.constant 0 : i32
    %c0_i32_0 = arith.constant 0 : i32
    %c0_i32_1 = arith.constant 0 : i32
    return %c0_i32, %c0_i32_0 : i32, i32
  }
  func.func @transform_4(%arg0: i32) -> (i32, i32) {
    %c0_i32 = arith.constant 0 : i32
    %c0_i32_0 = arith.constant 0 : i32
    %c0_i32_1 = arith.constant 0 : i32
    return %c0_i32, %c0_i32_0 : i32, i32
  }
  func.func @transform_5(%arg0: i32) -> (i32, i32) {
    %c0_i32 = arith.constant 0 : i32
    %c0_i32_0 = arith.constant 0 : i32
    return %arg0, %c0_i32 : i32, i32
  }
}

</mosaic_0001>

<bundles_post_ra>
// kernel: squeeze.1
= control target key start
LH: loop header
LB: loop body
LE: loop exit
PB: predicated region body
PF: predicated region fallthrough
CT: control target
= control target key end

     0   :  { %vm590_vm0 = vcmask 1047556   ;;  %s3723_s4 = smov 124   ;;  %s3724_s5 = smov 122   ;;  %vm450_vm1 = vcmask 15360   ;;  %s4513_s0 = inlined_call_operand.vmem [shape: bf16[2,1,28,28], index: 0, kind: input, shape index: {}]   ;;  %s4514_s1 = inlined_call_operand.vmem [shape: bf16[2,14,2,14,2], index: 1, kind: output, shape index: {}]  }
   0x1   :  { %v3061_v0 = vld [vmem:[%s4513_s0 + $0x7] sm:$0x1]  ;;  %v3062_v1 = vld [vmem:[%s4513_s0 + $0x6] sm:$0x1]  ;;  %v3063_v2 = vld [vmem:[%s4513_s0 + $0x5] sm:$0x1] }
   0x2   :  { %v337_v3 = vunpack.c.l.bf16 %v3061_v0  ;;  %v353_v4 = vunpack.c.l.bf16 %v3062_v1  ;;  %v369_v5 = vunpack.c.l.bf16 %v3063_v2  ;;  %v3064_v6 = vld [vmem:[%s4513_s0 + $0x4] sm:$0x1]  ;;  %v3065_v7 = vld [vmem:[%s4513_s0 + $0x3] sm:$0x1]  ;;  %v3066_v8 = vld [vmem:[%s4513_s0 + $0x2] sm:$0x1] }
   0x3   :  { %v385_v9 = vunpack.c.l.bf16 %v3064_v6  ;;  %v401_v10 = vunpack.c.l.bf16 %v3065_v7  ;;  %v417_v11 = vunpack.c.l.bf16 %v3066_v8  ;;  %v3067_v12 = vld [vmem:[%s4513_s0 + $0x1] sm:$0x1]  ;;  %v445_v13 = vld [vmem:[%s4513_s0] sm:$0x1]  ;;  %v3045_v16 = vld [vmem:[%s4513_s0 + $0x17] sm:$0x1] }
   0x4   :  { %340 = vst [vmem:[#allocation1 + $0x38] sm:$0x3] %v337_v3  ;;  %356 = vst [vmem:[#allocation1 + $0x30] sm:$0x3] %v353_v4  ;;  %v432_v14 = vunpack.c.l.bf16 %v3067_v12  ;;  %v446_v15 = vunpack.c.l.bf16 %v445_v13  ;;  %v3046_v17 = vld [vmem:[%s4513_s0 + $0x16] sm:$0x1]  ;;  %v81_v19 = vunpack.c.l.bf16 %v3045_v16 }
   0x5   :  { %372 = vst [vmem:[#allocation1 + $0x28] sm:$0x3] %v369_v5  ;;  %v3047_v18 = vld [vmem:[%s4513_s0 + $0x15] sm:$0x1]  ;;  %388 = vst [vmem:[#allocation1 + $0x20] sm:$0x3] %v385_v9  ;;  %v97_v20 = vunpack.c.l.bf16 %v3046_v17 }
   0x6   :  { %404 = vst [vmem:[#allocation1 + $0x18] sm:$0x3] %v401_v10  ;;  %420 = vst [vmem:[#allocation1 + $0x10] sm:$0x3] %v417_v11  ;;  %v113_v21 = vunpack.c.l.bf16 %v3047_v18  ;;  %v3048_v22 = vld [vmem:[%s4513_s0 + $0x14] sm:$0x1] }
   0x7   :  { %v3049_v23 = vld [vmem:[%s4513_s0 + $0x13] sm:$0x1]  ;;  %v3050_v24 = vld [vmem:[%s4513_s0 + $0x12] sm:$0x1]  ;;  %435 = vst [vmem:[#allocation1 + $0x8] sm:$0x3] %v432_v14  ;;  %v129_v25 = vunpack.c.l.bf16 %v3048_v22 }
   0x8   :  { %448 = vst [vmem:[#allocation1] sm:$0x3] %v446_v15  ;;  %v145_v26 = vunpack.c.l.bf16 %v3049_v23  ;;  %v161_v27 = vunpack.c.l.bf16 %v3050_v24  ;;  %v3051_v28 = vld [vmem:[%s4513_s0 + $0x11] sm:$0x1]  ;;  %v3052_v29 = vld [vmem:[%s4513_s0 + $0x10] sm:$0x1] }
   0x9   :  { %v3053_v30 = vld [vmem:[%s4513_s0 + $0xf] sm:$0x1]  ;;  %84 = vst [vmem:[#allocation1 + $0xb8] sm:$0x3] %v81_v19  ;;  %100 = vst [vmem:[#allocation1 + $0xb0] sm:$0x3] %v97_v20  ;;  %v177_v31 = vunpack.c.l.bf16 %v3051_v28  ;;  %v193_v32 = vunpack.c.l.bf16 %v3052_v29 }
   0xa   :  { %116 = vst [vmem:[#allocation1 + $0xa8] sm:$0x3] %v113_v21  ;;  %v209_v33 = vunpack.c.l.bf16 %v3053_v30  ;;  %v3054_v34 = vld [vmem:[%s4513_s0 + $0xe] sm:$0x1]  ;;  %v3055_v35 = vld [vmem:[%s4513_s0 + $0xd] sm:$0x1] }
   0xb   :  { %v3056_v36 = vld [vmem:[%s4513_s0 + $0xc] sm:$0x1]  ;;  %132 = vst [vmem:[#allocation1 + $0xa0] sm:$0x3] %v129_v25  ;;  %148 = vst [vmem:[#allocation1 + $0x98] sm:$0x3] %v145_v26  ;;  %v225_v37 = vunpack.c.l.bf16 %v3054_v34  ;;  %v241_v38 = vunpack.c.l.bf16 %v3055_v35 }
   0xc   :  { %164 = vst [vmem:[#allocation1 + $0x90] sm:$0x3] %v161_v27  ;;  %v257_v39 = vunpack.c.l.bf16 %v3056_v36  ;;  %v3057_v40 = vld [vmem:[%s4513_s0 + $0xb] sm:$0x1]  ;;  %v3058_v41 = vld [vmem:[%s4513_s0 + $0xa] sm:$0x1] }
   0xd   :  { %v3059_v42 = vld [vmem:[%s4513_s0 + $0x9] sm:$0x1]  ;;  %180 = vst [vmem:[#allocation1 + $0x88] sm:$0x3] %v177_v31  ;;  %196 = vst [vmem:[#allocation1 + $0x80] sm:$0x3] %v193_v32  ;;  %v273_v43 = vunpack.c.l.bf16 %v3057_v40  ;;  %v289_v44 = vunpack.c.l.bf16 %v3058_v41 }
   0xe   :  { %212 = vst [vmem:[#allocation1 + $0x78] sm:$0x3] %v209_v33  ;;  %v305_v45 = vunpack.c.l.bf16 %v3059_v42  ;;  %v3060_v46 = vld [vmem:[%s4513_s0 + $0x8] sm:$0x1]  ;;  %v3041_v47 = vld [vmem:[%s4513_s0 + $0x1b] sm:$0x1] }
   0xf   :  { %v3042_v48 = vld [vmem:[%s4513_s0 + $0x1a] sm:$0x1]  ;;  %228 = vst [vmem:[#allocation1 + $0x70] sm:$0x3] %v225_v37  ;;  %244 = vst [vmem:[#allocation1 + $0x68] sm:$0x3] %v241_v38  ;;  %v321_v49 = vunpack.c.l.bf16 %v3060_v46  ;;  %v17_v50 = vunpack.c.l.bf16 %v3041_v47 }
  0x10   :  { %260 = vst [vmem:[#allocation1 + $0x60] sm:$0x3] %v257_v39  ;;  %v33_v51 = vunpack.c.l.bf16 %v3042_v48  ;;  %v3043_v52 = vld [vmem:[%s4513_s0 + $0x19] sm:$0x1]  ;;  %v3044_v53 = vld [vmem:[%s4513_s0 + $0x18] sm:$0x1] }
  0x11   :  { %v606_v54 = vld.sshfl [vmem:[#allocation1 + $0x30] sm:$0xff pattern:$0x98100000]   ;;  %276 = vst [vmem:[#allocation1 + $0x58] sm:$0x3] %v273_v43  ;;  %v49_v55 = vunpack.c.l.bf16 %v3043_v52  ;;  %v65_v56 = vunpack.c.l.bf16 %v3044_v53  ;;  %s3722_s0 = smov 126  }
  0x12   :  { %292 = vst [vmem:[#allocation1 + $0x50] sm:$0x3] %v289_v44  ;;  %308 = vst [vmem:[#allocation1 + $0x48] sm:$0x3] %v305_v45  ;;  %s3725_s6 = smov 120   ;;  %s3726_s7 = smov 118  }
  0x13   :  { %v589_v57 = vld.sshfl [vmem:[#allocation1 + $0x10] sm:$0xff pattern:$0x98100000]   ;;  %v604_v58 = vld.sshfl [vmem:[#allocation1 + $0x20] sm:$0xff pattern:$0x99999810]  }
  0x14   :  { %324 = vst [vmem:[#allocation1 + $0x40] sm:$0x3] %v321_v49  ;;  %20 = vst [vmem:[#allocation1 + $0xd8] sm:$0x3] %v17_v50  ;;  %v608_v60 = vsel %vm590_vm0, %v606_v54, %v604_v58  ;;  %v453_v17 = vld [vmem:[#allocation1 + $0x8] sm:$0x3]  }
  0x15   :  { %36 = vst [vmem:[#allocation1 + $0xd0] sm:$0x3] %v33_v51  ;;  %v587_v59 = vld.sshfl [vmem:[#allocation1] sm:$0xff pattern:$0x99999810]   ;;  %s3727_s8 = smov 116  }
  0x16   :  { %52 = vst [vmem:[#allocation1 + $0xc8] sm:$0x3] %v49_v55  ;;  %68 = vst [vmem:[#allocation1 + $0xc0] sm:$0x3] %v65_v56  ;;  %v591_v61 = vsel %vm590_vm0, %v589_v57, %v587_v59  ;;  %v458_v18 = vld [vmem:[#allocation1 + $0x10] sm:$0x3]  }
  0x17   :  { %v674_v62 = vld.sshfl [vmem:[#allocation1 + $0xb0] sm:$0xff pattern:$0x98100000]   ;;  %v3831_v63 = vpack.i.bf16 %v608_v60, %v591_v61  ;;  %v672_v1 = vld.sshfl [vmem:[#allocation1 + $0xa0] sm:$0xff pattern:$0x99999810]  }
  0x18   :  { %v657_v0 = vld.sshfl [vmem:[#allocation1 + $0x90] sm:$0xff pattern:$0x98100000]   ;;  %v655_v2 = vld.sshfl [vmem:[#allocation1 + $0x80] sm:$0xff pattern:$0x99999810]   ;;  %v676_v3 = vsel %vm590_vm0, %v674_v62, %v672_v1 }
  0x19   :  { %3528 = vrot.lane.b32.xlu0 %v3831_v63, %s3722_s0  ;;  %v659_v4 = vsel %vm590_vm0, %v657_v0, %v655_v2  ;;  %v638_v5 = vld.sshfl [vmem:[#allocation1 + $0x60] sm:$0xff pattern:$0x99999810]   ;;  %v640_v6 = vld.sshfl [vmem:[#allocation1 + $0x70] sm:$0xff pattern:$0x98100000]  }
  0x1a   :  { %v3836_v7 = vpack.i.bf16 %v676_v3, %v659_v4  ;;  %v623_v8 = vld.sshfl [vmem:[#allocation1 + $0x50] sm:$0xff pattern:$0x98100000]   ;;  %v642_v9 = vsel %vm590_vm0, %v640_v6, %v638_v5  ;;  %456 = vst.msk [vmem:[#allocation0 + $0x20] ss:$16 sm:$0x3] %vm450_vm1, %v453_v17  }
  0x1b   :  { %v621_v10 = vld.sshfl [vmem:[#allocation1 + $0x40] sm:$0xff pattern:$0x99999810]   ;;  %v503_v16 = vld [vmem:[#allocation1 + $0x58] sm:$0x3]   ;;  %s3728_s9 = smov 114  }
  0x1c   :  { %v691_v11 = vld.sshfl [vmem:[#allocation1 + $0xd0] sm:$0xff pattern:$0x98100000]   ;;  %3538 = vrot.lane.b32.xlu1 %v3836_v7, %s3722_s0  ;;  %v625_v12 = vsel %vm590_vm0, %v623_v8, %v621_v10  ;;  %506 = vst.msk [vmem:[#allocation0 + $0x160] ss:$16 sm:$0x3] %vm450_vm1, %v503_v16  }
  0x1d   :  { %v689_v13 = vld.sshfl [vmem:[#allocation1 + $0xc0] sm:$0xff pattern:$0x99999810]   ;;  %v3841_v14 = vpack.i.bf16 %v642_v9, %v625_v12  ;;  %461 = vst.msk [vmem:[#allocation0 + $0x40] ss:$16 sm:$0x3] %vm450_vm1, %v458_v18  }
  0x1e   :  { %v3844_v15 = vsel %vm590_vm0, %v691_v11, %v689_v13  ;;  %v463_v19 = vld [vmem:[#allocation1 + $0x18] sm:$0x3]   ;;  %v449_v20 = vld [vmem:[#allocation1] sm:$0x3]   ;;  %v473_v22 = vld [vmem:[#allocation1 + $0x28] sm:$0x3]  }
  0x1f   :  { %3533 = vrot.lane.b32.xlu0 %v3841_v14, %s3722_s0  ;;  %v468_v21 = vld [vmem:[#allocation1 + $0x20] sm:$0x3]   ;;  %466 = vst.msk [vmem:[#allocation0 + $0x60] ss:$16 sm:$0x3] %vm450_vm1, %v463_v19   ;;  %s3729_s10 = smov 112  }
  0x20   :  { %694 = vrot.lane.b32.xlu1 %v3844_v15, %s3722_s0  ;;  %451 = vst.msk [vmem:[#allocation0] ss:$16 sm:$0x3] %vm450_vm1, %v449_v20   ;;  %471 = vst.msk [vmem:[#allocation0 + $0x80] ss:$16 sm:$0x3] %vm450_vm1, %v468_v21  }
  0x21   :  { %v478_v23 = vld [vmem:[#allocation1 + $0x30] sm:$0x3]   ;;  %v483_v24 = vld [vmem:[#allocation1 + $0x38] sm:$0x3]   ;;  %v488_v25 = vld [vmem:[#allocation1 + $0x40] sm:$0x3]  }
  0x22   :  { %476 = vst.msk [vmem:[#allocation0 + $0xa0] ss:$16 sm:$0x3] %vm450_vm1, %v473_v22   ;;  %481 = vst.msk [vmem:[#allocation0 + $0xc0] ss:$16 sm:$0x3] %vm450_vm1, %v478_v23  }
  0x23   :  { %3543 = vrot.lane.b32.xlu0 %v3831_v63, %s3723_s4  ;;  %486 = vst.msk [vmem:[#allocation0 + $0xe0] ss:$16 sm:$0x3] %vm450_vm1, %v483_v24   ;;  %491 = vst.msk [vmem:[#allocation0 + $0x100] ss:$16 sm:$0x3] %vm450_vm1, %v488_v25  }
  0x24   :  { %3548 = vrot.lane.b32.xlu1 %v3841_v14, %s3723_s4  ;;  %v508_v26 = vld [vmem:[#allocation1 + $0x60] sm:$0x3]   ;;  %v513_v27 = vld [vmem:[#allocation1 + $0x68] sm:$0x3]   ;;  %v518_v28 = vld [vmem:[#allocation1 + $0x70] sm:$0x3]  }
  0x25   :  { %511 = vst.msk [vmem:[#allocation0 + $0x180] ss:$16 sm:$0x3] %vm450_vm1, %v508_v26   ;;  %516 = vst.msk [vmem:[#allocation0 + $0x1a0] ss:$16 sm:$0x3] %vm450_vm1, %v513_v27  }
  0x26   :  { %v523_v29 = vld [vmem:[#allocation1 + $0x78] sm:$0x3]   ;;  %521 = vst.msk [vmem:[#allocation0 + $0x1c0] ss:$16 sm:$0x3] %vm450_vm1, %v518_v28   ;;  %s3730_s11 = smov 110  }
  0x27   :  { %3553 = vrot.lane.b32.xlu0 %v3836_v7, %s3723_s4  ;;  %526 = vst.msk [vmem:[#allocation0 + $0x1e0] ss:$16 sm:$0x3] %vm450_vm1, %v523_v29   ;;  %v493_v30 = vld [vmem:[#allocation1 + $0x48] sm:$0x3]   ;;  %s3731_s12 = smov 108  }
  0x28   :  { %812 = vrot.lane.b32.xlu1 %v3844_v15, %s3723_s4  ;;  %v498_v31 = vld [vmem:[#allocation1 + $0x50] sm:$0x3]   ;;  %496 = vst.msk [vmem:[#allocation0 + $0x120] ss:$16 sm:$0x3] %vm450_vm1, %v493_v30   ;;  %s3732_s13 = smov 106  }
  0x29   :  { %501 = vst.msk [vmem:[#allocation0 + $0x140] ss:$16 sm:$0x3] %vm450_vm1, %v498_v31   ;;  %v568_v32 = vld [vmem:[#allocation1 + $0xc0] sm:$0x3]   ;;  %s3733_s14 = smov 104  }
  0x2a   :  { %v573_v33 = vld [vmem:[#allocation1 + $0xc8] sm:$0x3]   ;;  %v578_v34 = vld [vmem:[#allocation1 + $0xd0] sm:$0x3]   ;;  %v528_v35 = vld [vmem:[#allocation1 + $0x80] sm:$0x3]  }
  0x2b   :  { %3558 = vrot.lane.b32.xlu0 %v3831_v63, %s3724_s5  ;;  %v533_v36 = vld [vmem:[#allocation1 + $0x88] sm:$0x3]   ;;  %v538_v37 = vld [vmem:[#allocation1 + $0x90] sm:$0x3]   ;;  %v543_v38 = vld [vmem:[#allocation1 + $0x98] sm:$0x3]  }
  0x2c   :  { %3563 = vrot.lane.b32.xlu1 %v3841_v14, %s3724_s5  ;;  %571 = vst.msk [vmem:[#allocation0 + $0x300] ss:$16 sm:$0x3] %vm450_vm1, %v568_v32   ;;  %576 = vst.msk [vmem:[#allocation0 + $0x320] ss:$16 sm:$0x3] %vm450_vm1, %v573_v33  }
  0x2d   :  { %581 = vst.msk [vmem:[#allocation0 + $0x340] ss:$16 sm:$0x3] %vm450_vm1, %v578_v34   ;;  %531 = vst.msk [vmem:[#allocation0 + $0x200] ss:$16 sm:$0x3] %vm450_vm1, %v528_v35  }
  0x2e   :  { %536 = vst.msk [vmem:[#allocation0 + $0x220] ss:$16 sm:$0x3] %vm450_vm1, %v533_v36   ;;  %541 = vst.msk [vmem:[#allocation0 + $0x240] ss:$16 sm:$0x3] %vm450_vm1, %v538_v37  }
  0x2f   :  { %3568 = vrot.lane.b32.xlu0 %v3836_v7, %s3724_s5  ;;  %v548_v39 = vld [vmem:[#allocation1 + $0xa0] sm:$0x3]   ;;  %v553_v40 = vld [vmem:[#allocation1 + $0xa8] sm:$0x3]   ;;  %v558_v41 = vld [vmem:[#allocation1 + $0xb0] sm:$0x3]  }
  0x30   :  { %930 = vrot.lane.b32.xlu1 %v3844_v15, %s3724_s5  ;;  %546 = vst.msk [vmem:[#allocation0 + $0x260] ss:$16 sm:$0x3] %vm450_vm1, %v543_v38   ;;  %551 = vst.msk [vmem:[#allocation0 + $0x280] ss:$16 sm:$0x3] %vm450_vm1, %v548_v39  }
  0x31   :  { %556 = vst.msk [vmem:[#allocation0 + $0x2a0] ss:$16 sm:$0x3] %vm450_vm1, %v553_v40   ;;  %v563_v42 = vld [vmem:[#allocation1 + $0xb8] sm:$0x3]   ;;  %s3734_s15 = smov 102  }
  0x32   :  { %561 = vst.msk [vmem:[#allocation0 + $0x2c0] ss:$16 sm:$0x3] %vm450_vm1, %v558_v41   ;;  %566 = vst.msk [vmem:[#allocation0 + $0x2e0] ss:$16 sm:$0x3] %vm450_vm1, %v563_v42  }
  0x33   :  { %3573 = vrot.lane.b32.xlu0 %v3831_v63, %s3725_s6  ;;  %v583_v43 = vld [vmem:[#allocation1 + $0xd8] sm:$0x3]  }
  0x34   :  { %3578 = vrot.lane.b32.xlu1 %v3841_v14, %s3725_s6  ;;  %586 = vst.msk [vmem:[#allocation0 + $0x360] ss:$16 sm:$0x3] %vm450_vm1, %v583_v43  }
  0x37   :  { %3583 = vrot.lane.b32.xlu0 %v3836_v7, %s3725_s6 }
  0x38   :  { %1048 = vrot.lane.b32.xlu1 %v3844_v15, %s3725_s6 }
  0x3b   :  { %3588 = vrot.lane.b32.xlu0 %v3831_v63, %s3726_s7 }
  0x3c   :  { %3593 = vrot.lane.b32.xlu1 %v3841_v14, %s3726_s7 }
  0x3f   :  { %3598 = vrot.lane.b32.xlu0 %v3836_v7, %s3726_s7 }
  0x40   :  { %1166 = vrot.lane.b32.xlu1 %v3844_v15, %s3726_s7 }
  0x43   :  { %3603 = vrot.lane.b32.xlu0 %v3831_v63, %s3727_s8 }
  0x44   :  { %3608 = vrot.lane.b32.xlu1 %v3841_v14, %s3727_s8 }
  0x47   :  { %3613 = vrot.lane.b32.xlu0 %v3836_v7, %s3727_s8 }
  0x48   :  { %1284 = vrot.lane.b32.xlu1 %v3844_v15, %s3727_s8 }
  0x4b   :  { %3618 = vrot.lane.b32.xlu0 %v3831_v63, %s3728_s9 }
  0x4c   :  { %3623 = vrot.lane.b32.xlu1 %v3841_v14, %s3728_s9 }
  0x4f   :  { %3628 = vrot.lane.b32.xlu0 %v3836_v7, %s3728_s9 }
  0x50   :  { %1402 = vrot.lane.b32.xlu1 %v3844_v15, %s3728_s9 }
  0x53   :  { %3633 = vrot.lane.b32.xlu0 %v3831_v63, %s3729_s10 }
  0x54   :  { %3638 = vrot.lane.b32.xlu1 %v3841_v14, %s3729_s10 }
  0x57   :  { %3643 = vrot.lane.b32.xlu0 %v3836_v7, %s3729_s10 }
  0x58   :  { %1520 = vrot.lane.b32.xlu1 %v3844_v15, %s3729_s10 }
  0x5b   :  { %3648 = vrot.lane.b32.xlu0 %v3831_v63, %s3730_s11 }
  0x5c   :  { %3653 = vrot.lane.b32.xlu1 %v3841_v14, %s3730_s11 }
  0x5f   :  { %3658 = vrot.lane.b32.xlu0 %v3836_v7, %s3730_s11 }
  0x60   :  { %1638 = vrot.lane.b32.xlu1 %v3844_v15, %s3730_s11 }
  0x63   :  { %3663 = vrot.lane.b32.xlu0 %v3831_v63, %s3731_s12 }
  0x64   :  { %3668 = vrot.lane.b32.xlu1 %v3841_v14, %s3731_s12 }
  0x67   :  { %3673 = vrot.lane.b32.xlu0 %v3836_v7, %s3731_s12 }
  0x68   :  { %1756 = vrot.lane.b32.xlu1 %v3844_v15, %s3731_s12 }
  0x6b   :  { %3678 = vrot.lane.b32.xlu0 %v3831_v63, %s3732_s13 }
  0x6c   :  { %3683 = vrot.lane.b32.xlu1 %v3841_v14, %s3732_s13 }
  0x6f   :  { %3688 = vrot.lane.b32.xlu0 %v3836_v7, %s3732_s13 }
  0x70   :  { %1874 = vrot.lane.b32.xlu1 %v3844_v15, %s3732_s13 }
  0x73   :  { %3693 = vrot.lane.b32.xlu0 %v3831_v63, %s3733_s14 }
  0x74   :  { %3698 = vrot.lane.b32.xlu1 %v3841_v14, %s3733_s14 }
  0x77   :  { %3703 = vrot.lane.b32.xlu0 %v3836_v7, %s3733_s14 }
  0x78   :  { %1992 = vrot.lane.b32.xlu1 %v3844_v15, %s3733_s14 }
  0x7b   :  { %3708 = vrot.lane.b32.xlu0 %v3831_v63, %s3734_s15 }
  0x7c   :  { %3713 = vrot.lane.b32.xlu1 %v3841_v14, %s3734_s15 }
  0x7f   :  { %3718 = vrot.lane.b32.xlu0 %v3836_v7, %s3734_s15 }
  0x80   :  { %2110 = vrot.lane.b32.xlu1 %v3844_v15, %s3734_s15 }
  0x8b   :  { %v3529_v44 = vpop.permute.xlu0 %3528 }
  0x8c   :  { %v3531_v45 = vunpack.i.h.bf16 %v3529_v44  ;;  %v3530_v46 = vunpack.i.l.bf16 %v3529_v44 }
  0x8e   :  { %613 = vst.msk [vmem:[#allocation0 + $0x81] ss:$16 sm:$0x3] %vm450_vm1, %v3531_v45   ;;  %615 = vst.msk [vmem:[#allocation0 + $0x81] ss:$16 sm:$0xc] %vm450_vm1, %v3531_v45   ;;  %v3539_v47 = vpop.permute.xlu1 %3538 }
  0x8f   :  { %617 = vst.msk [vmem:[#allocation0 + $0x81] ss:$16 sm:$0x30] %vm450_vm1, %v3531_v45   ;;  %619 = vst.msk [vmem:[#allocation0 + $0x81] ss:$16 sm:$0xc0] %vm450_vm1, %v3531_v45   ;;  %v3541_v48 = vunpack.i.h.bf16 %v3539_v47  ;;  %v3540_v49 = vunpack.i.l.bf16 %v3539_v47 }
  0x90   :  { %596 = vst.msk [vmem:[#allocation0 + $0x1] ss:$16 sm:$0x3] %vm450_vm1, %v3530_v46   ;;  %598 = vst.msk [vmem:[#allocation0 + $0x1] ss:$16 sm:$0xc] %vm450_vm1, %v3530_v46  }
  0x91   :  { %600 = vst.msk [vmem:[#allocation0 + $0x1] ss:$16 sm:$0x30] %vm450_vm1, %v3530_v46   ;;  %602 = vst.msk [vmem:[#allocation0 + $0x1] ss:$16 sm:$0xc0] %vm450_vm1, %v3530_v46   ;;  %v3534_v50 = vpop.permute.xlu0 %3533 }
  0x92   :  { %681 = vst.msk [vmem:[#allocation0 + $0x281] ss:$16 sm:$0x3] %vm450_vm1, %v3541_v48   ;;  %683 = vst.msk [vmem:[#allocation0 + $0x281] ss:$16 sm:$0xc] %vm450_vm1, %v3541_v48   ;;  %v3536_v51 = vunpack.i.h.bf16 %v3534_v50  ;;  %v3535_v52 = vunpack.i.l.bf16 %v3534_v50  ;;  %v695_v53 = vpop.permute.xlu1 %694  }
  0x93   :  { %685 = vst.msk [vmem:[#allocation0 + $0x281] ss:$16 sm:$0x30] %vm450_vm1, %v3541_v48   ;;  %687 = vst.msk [vmem:[#allocation0 + $0x281] ss:$16 sm:$0xc0] %vm450_vm1, %v3541_v48  }
  0x94   :  { %664 = vst.msk [vmem:[#allocation0 + $0x201] ss:$16 sm:$0x3] %vm450_vm1, %v3540_v49   ;;  %666 = vst.msk [vmem:[#allocation0 + $0x201] ss:$16 sm:$0xc] %vm450_vm1, %v3540_v49  }
  0x95   :  { %668 = vst.msk [vmem:[#allocation0 + $0x201] ss:$16 sm:$0x30] %vm450_vm1, %v3540_v49   ;;  %670 = vst.msk [vmem:[#allocation0 + $0x201] ss:$16 sm:$0xc0] %vm450_vm1, %v3540_v49   ;;  %v3544_v54 = vpop.permute.xlu0 %3543 }
  0x96   :  { %698 = vst.msk [vmem:[#allocation0 + $0x301] ss:$16 sm:$0x3] %vm450_vm1, %v695_v53   ;;  %700 = vst.msk [vmem:[#allocation0 + $0x301] ss:$16 sm:$0xc] %vm450_vm1, %v695_v53   ;;  %v3546_v55 = vunpack.i.h.bf16 %v3544_v54  ;;  %v3545_v56 = vunpack.i.l.bf16 %v3544_v54  ;;  %v3549_v57 = vpop.permute.xlu1 %3548 }
  0x97   :  { %702 = vst.msk [vmem:[#allocation0 + $0x301] ss:$16 sm:$0x30] %vm450_vm1, %v695_v53   ;;  %704 = vst.msk [vmem:[#allocation0 + $0x301] ss:$16 sm:$0xc0] %vm450_vm1, %v695_v53   ;;  %v3551_v58 = vunpack.i.h.bf16 %v3549_v57  ;;  %v3550_v59 = vunpack.i.l.bf16 %v3549_v57 }
  0x98   :  { %647 = vst.msk [vmem:[#allocation0 + $0x181] ss:$16 sm:$0x3] %vm450_vm1, %v3536_v51   ;;  %649 = vst.msk [vmem:[#allocation0 + $0x181] ss:$16 sm:$0xc] %vm450_vm1, %v3536_v51  }
  0x99   :  { %651 = vst.msk [vmem:[#allocation0 + $0x181] ss:$16 sm:$0x30] %vm450_vm1, %v3536_v51   ;;  %653 = vst.msk [vmem:[#allocation0 + $0x181] ss:$16 sm:$0xc0] %vm450_vm1, %v3536_v51   ;;  %v3554_v60 = vpop.permute.xlu0 %3553 }
  0x9a   :  { %630 = vst.msk [vmem:[#allocation0 + $0x101] ss:$16 sm:$0x3] %vm450_vm1, %v3535_v52   ;;  %632 = vst.msk [vmem:[#allocation0 + $0x101] ss:$16 sm:$0xc] %vm450_vm1, %v3535_v52   ;;  %v3556_v61 = vunpack.i.h.bf16 %v3554_v60  ;;  %v3555_v62 = vunpack.i.l.bf16 %v3554_v60  ;;  %v813_v63 = vpop.permute.xlu1 %812  }
  0x9b   :  { %634 = vst.msk [vmem:[#allocation0 + $0x101] ss:$16 sm:$0x30] %vm450_vm1, %v3535_v52   ;;  %636 = vst.msk [vmem:[#allocation0 + $0x101] ss:$16 sm:$0xc0] %vm450_vm1, %v3535_v52  }
  0x9c   :  { %731 = vst.msk [vmem:[#allocation0 + $0x82] ss:$16 sm:$0x3] %vm450_vm1, %v3546_v55   ;;  %733 = vst.msk [vmem:[#allocation0 + $0x82] ss:$16 sm:$0xc] %vm450_vm1, %v3546_v55  }
  0x9d   :  { %735 = vst.msk [vmem:[#allocation0 + $0x82] ss:$16 sm:$0x30] %vm450_vm1, %v3546_v55   ;;  %737 = vst.msk [vmem:[#allocation0 + $0x82] ss:$16 sm:$0xc0] %vm450_vm1, %v3546_v55   ;;  %v3559_v0 = vpop.permute.xlu0 %3558 }
  0x9e   :  { %714 = vst.msk [vmem:[#allocation0 + $0x2] ss:$16 sm:$0x3] %vm450_vm1, %v3545_v56   ;;  %716 = vst.msk [vmem:[#allocation0 + $0x2] ss:$16 sm:$0xc] %vm450_vm1, %v3545_v56   ;;  %v3561_v1 = vunpack.i.h.bf16 %v3559_v0  ;;  %v3560_v2 = vunpack.i.l.bf16 %v3559_v0  ;;  %v3564_v3 = vpop.permute.xlu1 %3563 }
  0x9f   :  { %718 = vst.msk [vmem:[#allocation0 + $0x2] ss:$16 sm:$0x30] %vm450_vm1, %v3545_v56   ;;  %720 = vst.msk [vmem:[#allocation0 + $0x2] ss:$16 sm:$0xc0] %vm450_vm1, %v3545_v56   ;;  %v3566_v4 = vunpack.i.h.bf16 %v3564_v3  ;;  %v3565_v5 = vunpack.i.l.bf16 %v3564_v3 }
  0xa0   :  { %765 = vst.msk [vmem:[#allocation0 + $0x182] ss:$16 sm:$0x3] %vm450_vm1, %v3551_v58   ;;  %767 = vst.msk [vmem:[#allocation0 + $0x182] ss:$16 sm:$0xc] %vm450_vm1, %v3551_v58  }
  0xa1   :  { %769 = vst.msk [vmem:[#allocation0 + $0x182] ss:$16 sm:$0x30] %vm450_vm1, %v3551_v58   ;;  %771 = vst.msk [vmem:[#allocation0 + $0x182] ss:$16 sm:$0xc0] %vm450_vm1, %v3551_v58   ;;  %v3569_v6 = vpop.permute.xlu0 %3568 }
  0xa2   :  { %748 = vst.msk [vmem:[#allocation0 + $0x102] ss:$16 sm:$0x3] %vm450_vm1, %v3550_v59   ;;  %750 = vst.msk [vmem:[#allocation0 + $0x102] ss:$16 sm:$0xc] %vm450_vm1, %v3550_v59   ;;  %v3571_v7 = vunpack.i.h.bf16 %v3569_v6  ;;  %v3570_v8 = vunpack.i.l.bf16 %v3569_v6  ;;  %v931_v9 = vpop.permute.xlu1 %930  }
  0xa3   :  { %752 = vst.msk [vmem:[#allocation0 + $0x102] ss:$16 sm:$0x30] %vm450_vm1, %v3550_v59   ;;  %754 = vst.msk [vmem:[#allocation0 + $0x102] ss:$16 sm:$0xc0] %vm450_vm1, %v3550_v59  }
  0xa4   :  { %816 = vst.msk [vmem:[#allocation0 + $0x302] ss:$16 sm:$0x3] %vm450_vm1, %v813_v63   ;;  %818 = vst.msk [vmem:[#allocation0 + $0x302] ss:$16 sm:$0xc] %vm450_vm1, %v813_v63  }
  0xa5   :  { %820 = vst.msk [vmem:[#allocation0 + $0x302] ss:$16 sm:$0x30] %vm450_vm1, %v813_v63   ;;  %822 = vst.msk [vmem:[#allocation0 + $0x302] ss:$16 sm:$0xc0] %vm450_vm1, %v813_v63   ;;  %v3574_v10 = vpop.permute.xlu0 %3573 }
  0xa6   :  { %799 = vst.msk [vmem:[#allocation0 + $0x282] ss:$16 sm:$0x3] %vm450_vm1, %v3556_v61   ;;  %801 = vst.msk [vmem:[#allocation0 + $0x282] ss:$16 sm:$0xc] %vm450_vm1, %v3556_v61   ;;  %v3576_v11 = vunpack.i.h.bf16 %v3574_v10  ;;  %v3575_v12 = vunpack.i.l.bf16 %v3574_v10  ;;  %v3579_v13 = vpop.permute.xlu1 %3578 }
  0xa7   :  { %803 = vst.msk [vmem:[#allocation0 + $0x282] ss:$16 sm:$0x30] %vm450_vm1, %v3556_v61   ;;  %805 = vst.msk [vmem:[#allocation0 + $0x282] ss:$16 sm:$0xc0] %vm450_vm1, %v3556_v61   ;;  %v3581_v14 = vunpack.i.h.bf16 %v3579_v13  ;;  %v3580_v15 = vunpack.i.l.bf16 %v3579_v13 }
  0xa8   :  { %782 = vst.msk [vmem:[#allocation0 + $0x202] ss:$16 sm:$0x3] %vm450_vm1, %v3555_v62   ;;  %784 = vst.msk [vmem:[#allocation0 + $0x202] ss:$16 sm:$0xc] %vm450_vm1, %v3555_v62  }
  0xa9   :  { %786 = vst.msk [vmem:[#allocation0 + $0x202] ss:$16 sm:$0x30] %vm450_vm1, %v3555_v62   ;;  %788 = vst.msk [vmem:[#allocation0 + $0x202] ss:$16 sm:$0xc0] %vm450_vm1, %v3555_v62   ;;  %v3584_v16 = vpop.permute.xlu0 %3583 }
  0xaa   :  { %849 = vst.msk [vmem:[#allocation0 + $0x83] ss:$16 sm:$0x3] %vm450_vm1, %v3561_v1   ;;  %851 = vst.msk [vmem:[#allocation0 + $0x83] ss:$16 sm:$0xc] %vm450_vm1, %v3561_v1   ;;  %v3586_v17 = vunpack.i.h.bf16 %v3584_v16  ;;  %v3585_v18 = vunpack.i.l.bf16 %v3584_v16  ;;  %v1049_v19 = vpop.permute.xlu1 %1048  }
  0xab   :  { %853 = vst.msk [vmem:[#allocation0 + $0x83] ss:$16 sm:$0x30] %vm450_vm1, %v3561_v1   ;;  %855 = vst.msk [vmem:[#allocation0 + $0x83] ss:$16 sm:$0xc0] %vm450_vm1, %v3561_v1  }
  0xac   :  { %832 = vst.msk [vmem:[#allocation0 + $0x3] ss:$16 sm:$0x3] %vm450_vm1, %v3560_v2   ;;  %834 = vst.msk [vmem:[#allocation0 + $0x3] ss:$16 sm:$0xc] %vm450_vm1, %v3560_v2  }
  0xad   :  { %836 = vst.msk [vmem:[#allocation0 + $0x3] ss:$16 sm:$0x30] %vm450_vm1, %v3560_v2   ;;  %838 = vst.msk [vmem:[#allocation0 + $0x3] ss:$16 sm:$0xc0] %vm450_vm1, %v3560_v2   ;;  %v3589_v20 = vpop.permute.xlu0 %3588 }
  0xae   :  { %883 = vst.msk [vmem:[#allocation0 + $0x183] ss:$16 sm:$0x3] %vm450_vm1, %v3566_v4   ;;  %885 = vst.msk [vmem:[#allocation0 + $0x183] ss:$16 sm:$0xc] %vm450_vm1, %v3566_v4   ;;  %v3591_v21 = vunpack.i.h.bf16 %v3589_v20  ;;  %v3590_v22 = vunpack.i.l.bf16 %v3589_v20  ;;  %v3594_v23 = vpop.permute.xlu1 %3593 }
  0xaf   :  { %887 = vst.msk [vmem:[#allocation0 + $0x183] ss:$16 sm:$0x30] %vm450_vm1, %v3566_v4   ;;  %889 = vst.msk [vmem:[#allocation0 + $0x183] ss:$16 sm:$0xc0] %vm450_vm1, %v3566_v4   ;;  %v3596_v24 = vunpack.i.h.bf16 %v3594_v23  ;;  %v3595_v25 = vunpack.i.l.bf16 %v3594_v23 }
  0xb0   :  { %866 = vst.msk [vmem:[#allocation0 + $0x103] ss:$16 sm:$0x3] %vm450_vm1, %v3565_v5   ;;  %868 = vst.msk [vmem:[#allocation0 + $0x103] ss:$16 sm:$0xc] %vm450_vm1, %v3565_v5  }
  0xb1   :  { %870 = vst.msk [vmem:[#allocation0 + $0x103] ss:$16 sm:$0x30] %vm450_vm1, %v3565_v5   ;;  %872 = vst.msk [vmem:[#allocation0 + $0x103] ss:$16 sm:$0xc0] %vm450_vm1, %v3565_v5   ;;  %v3599_v26 = vpop.permute.xlu0 %3598 }
  0xb2   :  { %934 = vst.msk [vmem:[#allocation0 + $0x303] ss:$16 sm:$0x3] %vm450_vm1, %v931_v9   ;;  %936 = vst.msk [vmem:[#allocation0 + $0x303] ss:$16 sm:$0xc] %vm450_vm1, %v931_v9   ;;  %v3601_v27 = vunpack.i.h.bf16 %v3599_v26  ;;  %v3600_v28 = vunpack.i.l.bf16 %v3599_v26  ;;  %v1167_v29 = vpop.permute.xlu1 %1166  }
  0xb3   :  { %938 = vst.msk [vmem:[#allocation0 + $0x303] ss:$16 sm:$0x30] %vm450_vm1, %v931_v9   ;;  %940 = vst.msk [vmem:[#allocation0 + $0x303] ss:$16 sm:$0xc0] %vm450_vm1, %v931_v9  }
  0xb4   :  { %917 = vst.msk [vmem:[#allocation0 + $0x283] ss:$16 sm:$0x3] %vm450_vm1, %v3571_v7   ;;  %919 = vst.msk [vmem:[#allocation0 + $0x283] ss:$16 sm:$0xc] %vm450_vm1, %v3571_v7  }
  0xb5   :  { %921 = vst.msk [vmem:[#allocation0 + $0x283] ss:$16 sm:$0x30] %vm450_vm1, %v3571_v7   ;;  %923 = vst.msk [vmem:[#allocation0 + $0x283] ss:$16 sm:$0xc0] %vm450_vm1, %v3571_v7   ;;  %v3604_v30 = vpop.permute.xlu0 %3603 }
  0xb6   :  { %900 = vst.msk [vmem:[#allocation0 + $0x203] ss:$16 sm:$0x3] %vm450_vm1, %v3570_v8   ;;  %902 = vst.msk [vmem:[#allocation0 + $0x203] ss:$16 sm:$0xc] %vm450_vm1, %v3570_v8   ;;  %v3606_v31 = vunpack.i.h.bf16 %v3604_v30  ;;  %v3605_v32 = vunpack.i.l.bf16 %v3604_v30  ;;  %v3609_v33 = vpop.permute.xlu1 %3608 }
  0xb7   :  { %904 = vst.msk [vmem:[#allocation0 + $0x203] ss:$16 sm:$0x30] %vm450_vm1, %v3570_v8   ;;  %906 = vst.msk [vmem:[#allocation0 + $0x203] ss:$16 sm:$0xc0] %vm450_vm1, %v3570_v8   ;;  %v3611_v34 = vunpack.i.h.bf16 %v3609_v33  ;;  %v3610_v35 = vunpack.i.l.bf16 %v3609_v33 }
  0xb8   :  { %967 = vst.msk [vmem:[#allocation0 + $0x84] ss:$16 sm:$0x3] %vm450_vm1, %v3576_v11   ;;  %969 = vst.msk [vmem:[#allocation0 + $0x84] ss:$16 sm:$0xc] %vm450_vm1, %v3576_v11  }
  0xb9   :  { %971 = vst.msk [vmem:[#allocation0 + $0x84] ss:$16 sm:$0x30] %vm450_vm1, %v3576_v11   ;;  %973 = vst.msk [vmem:[#allocation0 + $0x84] ss:$16 sm:$0xc0] %vm450_vm1, %v3576_v11   ;;  %v3614_v36 = vpop.permute.xlu0 %3613 }
  0xba   :  { %950 = vst.msk [vmem:[#allocation0 + $0x4] ss:$16 sm:$0x3] %vm450_vm1, %v3575_v12   ;;  %952 = vst.msk [vmem:[#allocation0 + $0x4] ss:$16 sm:$0xc] %vm450_vm1, %v3575_v12   ;;  %v3616_v37 = vunpack.i.h.bf16 %v3614_v36  ;;  %v3615_v38 = vunpack.i.l.bf16 %v3614_v36  ;;  %v1285_v39 = vpop.permute.xlu1 %1284  }
  0xbb   :  { %954 = vst.msk [vmem:[#allocation0 + $0x4] ss:$16 sm:$0x30] %vm450_vm1, %v3575_v12   ;;  %956 = vst.msk [vmem:[#allocation0 + $0x4] ss:$16 sm:$0xc0] %vm450_vm1, %v3575_v12  }
  0xbc   :  { %1001 = vst.msk [vmem:[#allocation0 + $0x184] ss:$16 sm:$0x3] %vm450_vm1, %v3581_v14   ;;  %1003 = vst.msk [vmem:[#allocation0 + $0x184] ss:$16 sm:$0xc] %vm450_vm1, %v3581_v14  }
  0xbd   :  { %1005 = vst.msk [vmem:[#allocation0 + $0x184] ss:$16 sm:$0x30] %vm450_vm1, %v3581_v14   ;;  %1007 = vst.msk [vmem:[#allocation0 + $0x184] ss:$16 sm:$0xc0] %vm450_vm1, %v3581_v14   ;;  %v3619_v40 = vpop.permute.xlu0 %3618 }
  0xbe   :  { %984 = vst.msk [vmem:[#allocation0 + $0x104] ss:$16 sm:$0x3] %vm450_vm1, %v3580_v15   ;;  %986 = vst.msk [vmem:[#allocation0 + $0x104] ss:$16 sm:$0xc] %vm450_vm1, %v3580_v15   ;;  %v3621_v41 = vunpack.i.h.bf16 %v3619_v40  ;;  %v3620_v42 = vunpack.i.l.bf16 %v3619_v40  ;;  %v3624_v43 = vpop.permute.xlu1 %3623 }
  0xbf   :  { %988 = vst.msk [vmem:[#allocation0 + $0x104] ss:$16 sm:$0x30] %vm450_vm1, %v3580_v15   ;;  %990 = vst.msk [vmem:[#allocation0 + $0x104] ss:$16 sm:$0xc0] %vm450_vm1, %v3580_v15   ;;  %v3626_v44 = vunpack.i.h.bf16 %v3624_v43  ;;  %v3625_v45 = vunpack.i.l.bf16 %v3624_v43 }
  0xc0   :  { %1052 = vst.msk [vmem:[#allocation0 + $0x304] ss:$16 sm:$0x3] %vm450_vm1, %v1049_v19   ;;  %1054 = vst.msk [vmem:[#allocation0 + $0x304] ss:$16 sm:$0xc] %vm450_vm1, %v1049_v19  }
  0xc1   :  { %1056 = vst.msk [vmem:[#allocation0 + $0x304] ss:$16 sm:$0x30] %vm450_vm1, %v1049_v19   ;;  %1058 = vst.msk [vmem:[#allocation0 + $0x304] ss:$16 sm:$0xc0] %vm450_vm1, %v1049_v19   ;;  %v3629_v46 = vpop.permute.xlu0 %3628 }
  0xc2   :  { %1035 = vst.msk [vmem:[#allocation0 + $0x284] ss:$16 sm:$0x3] %vm450_vm1, %v3586_v17   ;;  %1037 = vst.msk [vmem:[#allocation0 + $0x284] ss:$16 sm:$0xc] %vm450_vm1, %v3586_v17   ;;  %v3631_v47 = vunpack.i.h.bf16 %v3629_v46  ;;  %v3630_v48 = vunpack.i.l.bf16 %v3629_v46  ;;  %v1403_v49 = vpop.permute.xlu1 %1402  }
  0xc3   :  { %1039 = vst.msk [vmem:[#allocation0 + $0x284] ss:$16 sm:$0x30] %vm450_vm1, %v3586_v17   ;;  %1041 = vst.msk [vmem:[#allocation0 + $0x284] ss:$16 sm:$0xc0] %vm450_vm1, %v3586_v17  }
  0xc4   :  { %1018 = vst.msk [vmem:[#allocation0 + $0x204] ss:$16 sm:$0x3] %vm450_vm1, %v3585_v18   ;;  %1020 = vst.msk [vmem:[#allocation0 + $0x204] ss:$16 sm:$0xc] %vm450_vm1, %v3585_v18  }
  0xc5   :  { %1022 = vst.msk [vmem:[#allocation0 + $0x204] ss:$16 sm:$0x30] %vm450_vm1, %v3585_v18   ;;  %1024 = vst.msk [vmem:[#allocation0 + $0x204] ss:$16 sm:$0xc0] %vm450_vm1, %v3585_v18   ;;  %v3634_v50 = vpop.permute.xlu0 %3633 }
  0xc6   :  { %1085 = vst.msk [vmem:[#allocation0 + $0x85] ss:$16 sm:$0x3] %vm450_vm1, %v3591_v21   ;;  %1087 = vst.msk [vmem:[#allocation0 + $0x85] ss:$16 sm:$0xc] %vm450_vm1, %v3591_v21   ;;  %v3636_v51 = vunpack.i.h.bf16 %v3634_v50  ;;  %v3635_v52 = vunpack.i.l.bf16 %v3634_v50  ;;  %v3639_v53 = vpop.permute.xlu1 %3638 }
  0xc7   :  { %1089 = vst.msk [vmem:[#allocation0 + $0x85] ss:$16 sm:$0x30] %vm450_vm1, %v3591_v21   ;;  %1091 = vst.msk [vmem:[#allocation0 + $0x85] ss:$16 sm:$0xc0] %vm450_vm1, %v3591_v21   ;;  %v3641_v54 = vunpack.i.h.bf16 %v3639_v53  ;;  %v3640_v55 = vunpack.i.l.bf16 %v3639_v53 }
  0xc8   :  { %1068 = vst.msk [vmem:[#allocation0 + $0x5] ss:$16 sm:$0x3] %vm450_vm1, %v3590_v22   ;;  %1070 = vst.msk [vmem:[#allocation0 + $0x5] ss:$16 sm:$0xc] %vm450_vm1, %v3590_v22  }
  0xc9   :  { %1072 = vst.msk [vmem:[#allocation0 + $0x5] ss:$16 sm:$0x30] %vm450_vm1, %v3590_v22   ;;  %1074 = vst.msk [vmem:[#allocation0 + $0x5] ss:$16 sm:$0xc0] %vm450_vm1, %v3590_v22   ;;  %v3644_v56 = vpop.permute.xlu0 %3643 }
  0xca   :  { %1119 = vst.msk [vmem:[#allocation0 + $0x185] ss:$16 sm:$0x3] %vm450_vm1, %v3596_v24   ;;  %1121 = vst.msk [vmem:[#allocation0 + $0x185] ss:$16 sm:$0xc] %vm450_vm1, %v3596_v24   ;;  %v3646_v57 = vunpack.i.h.bf16 %v3644_v56  ;;  %v3645_v58 = vunpack.i.l.bf16 %v3644_v56  ;;  %v1521_v59 = vpop.permute.xlu1 %1520  }
  0xcb   :  { %1123 = vst.msk [vmem:[#allocation0 + $0x185] ss:$16 sm:$0x30] %vm450_vm1, %v3596_v24   ;;  %1125 = vst.msk [vmem:[#allocation0 + $0x185] ss:$16 sm:$0xc0] %vm450_vm1, %v3596_v24  }
  0xcc   :  { %1102 = vst.msk [vmem:[#allocation0 + $0x105] ss:$16 sm:$0x3] %vm450_vm1, %v3595_v25   ;;  %1104 = vst.msk [vmem:[#allocation0 + $0x105] ss:$16 sm:$0xc] %vm450_vm1, %v3595_v25  }
  0xcd   :  { %1106 = vst.msk [vmem:[#allocation0 + $0x105] ss:$16 sm:$0x30] %vm450_vm1, %v3595_v25   ;;  %1108 = vst.msk [vmem:[#allocation0 + $0x105] ss:$16 sm:$0xc0] %vm450_vm1, %v3595_v25   ;;  %v3649_v60 = vpop.permute.xlu0 %3648 }
  0xce   :  { %1170 = vst.msk [vmem:[#allocation0 + $0x305] ss:$16 sm:$0x3] %vm450_vm1, %v1167_v29   ;;  %1172 = vst.msk [vmem:[#allocation0 + $0x305] ss:$16 sm:$0xc] %vm450_vm1, %v1167_v29   ;;  %v3651_v61 = vunpack.i.h.bf16 %v3649_v60  ;;  %v3650_v62 = vunpack.i.l.bf16 %v3649_v60  ;;  %v3654_v63 = vpop.permute.xlu1 %3653 }
  0xcf   :  { %1174 = vst.msk [vmem:[#allocation0 + $0x305] ss:$16 sm:$0x30] %vm450_vm1, %v1167_v29   ;;  %1176 = vst.msk [vmem:[#allocation0 + $0x305] ss:$16 sm:$0xc0] %vm450_vm1, %v1167_v29   ;;  %v3656_v0 = vunpack.i.h.bf16 %v3654_v63  ;;  %v3655_v1 = vunpack.i.l.bf16 %v3654_v63 }
  0xd0   :  { %1153 = vst.msk [vmem:[#allocation0 + $0x285] ss:$16 sm:$0x3] %vm450_vm1, %v3601_v27   ;;  %1155 = vst.msk [vmem:[#allocation0 + $0x285] ss:$16 sm:$0xc] %vm450_vm1, %v3601_v27  }
  0xd1   :  { %1157 = vst.msk [vmem:[#allocation0 + $0x285] ss:$16 sm:$0x30] %vm450_vm1, %v3601_v27   ;;  %1159 = vst.msk [vmem:[#allocation0 + $0x285] ss:$16 sm:$0xc0] %vm450_vm1, %v3601_v27   ;;  %v3659_v2 = vpop.permute.xlu0 %3658 }
  0xd2   :  { %1136 = vst.msk [vmem:[#allocation0 + $0x205] ss:$16 sm:$0x3] %vm450_vm1, %v3600_v28   ;;  %1138 = vst.msk [vmem:[#allocation0 + $0x205] ss:$16 sm:$0xc] %vm450_vm1, %v3600_v28   ;;  %v3661_v3 = vunpack.i.h.bf16 %v3659_v2  ;;  %v3660_v4 = vunpack.i.l.bf16 %v3659_v2  ;;  %v1639_v5 = vpop.permute.xlu1 %1638  }
  0xd3   :  { %1140 = vst.msk [vmem:[#allocation0 + $0x205] ss:$16 sm:$0x30] %vm450_vm1, %v3600_v28   ;;  %1142 = vst.msk [vmem:[#allocation0 + $0x205] ss:$16 sm:$0xc0] %vm450_vm1, %v3600_v28  }
  0xd4   :  { %1203 = vst.msk [vmem:[#allocation0 + $0x86] ss:$16 sm:$0x3] %vm450_vm1, %v3606_v31   ;;  %1205 = vst.msk [vmem:[#allocation0 + $0x86] ss:$16 sm:$0xc] %vm450_vm1, %v3606_v31  }
  0xd5   :  { %1207 = vst.msk [vmem:[#allocation0 + $0x86] ss:$16 sm:$0x30] %vm450_vm1, %v3606_v31   ;;  %1209 = vst.msk [vmem:[#allocation0 + $0x86] ss:$16 sm:$0xc0] %vm450_vm1, %v3606_v31   ;;  %v3664_v6 = vpop.permute.xlu0 %3663 }
  0xd6   :  { %1186 = vst.msk [vmem:[#allocation0 + $0x6] ss:$16 sm:$0x3] %vm450_vm1, %v3605_v32   ;;  %1188 = vst.msk [vmem:[#allocation0 + $0x6] ss:$16 sm:$0xc] %vm450_vm1, %v3605_v32   ;;  %v3666_v7 = vunpack.i.h.bf16 %v3664_v6  ;;  %v3665_v8 = vunpack.i.l.bf16 %v3664_v6  ;;  %v3669_v9 = vpop.permute.xlu1 %3668 }
  0xd7   :  { %1190 = vst.msk [vmem:[#allocation0 + $0x6] ss:$16 sm:$0x30] %vm450_vm1, %v3605_v32   ;;  %1192 = vst.msk [vmem:[#allocation0 + $0x6] ss:$16 sm:$0xc0] %vm450_vm1, %v3605_v32   ;;  %v3671_v10 = vunpack.i.h.bf16 %v3669_v9  ;;  %v3670_v11 = vunpack.i.l.bf16 %v3669_v9 }
  0xd8   :  { %1237 = vst.msk [vmem:[#allocation0 + $0x186] ss:$16 sm:$0x3] %vm450_vm1, %v3611_v34   ;;  %1239 = vst.msk [vmem:[#allocation0 + $0x186] ss:$16 sm:$0xc] %vm450_vm1, %v3611_v34  }
  0xd9   :  { %1241 = vst.msk [vmem:[#allocation0 + $0x186] ss:$16 sm:$0x30] %vm450_vm1, %v3611_v34   ;;  %1243 = vst.msk [vmem:[#allocation0 + $0x186] ss:$16 sm:$0xc0] %vm450_vm1, %v3611_v34   ;;  %v3674_v12 = vpop.permute.xlu0 %3673 }
  0xda   :  { %1220 = vst.msk [vmem:[#allocation0 + $0x106] ss:$16 sm:$0x3] %vm450_vm1, %v3610_v35   ;;  %1222 = vst.msk [vmem:[#allocation0 + $0x106] ss:$16 sm:$0xc] %vm450_vm1, %v3610_v35   ;;  %v3676_v13 = vunpack.i.h.bf16 %v3674_v12  ;;  %v3675_v14 = vunpack.i.l.bf16 %v3674_v12  ;;  %v1757_v15 = vpop.permute.xlu1 %1756  }
  0xdb   :  { %1224 = vst.msk [vmem:[#allocation0 + $0x106] ss:$16 sm:$0x30] %vm450_vm1, %v3610_v35   ;;  %1226 = vst.msk [vmem:[#allocation0 + $0x106] ss:$16 sm:$0xc0] %vm450_vm1, %v3610_v35  }
  0xdc   :  { %1288 = vst.msk [vmem:[#allocation0 + $0x306] ss:$16 sm:$0x3] %vm450_vm1, %v1285_v39   ;;  %1290 = vst.msk [vmem:[#allocation0 + $0x306] ss:$16 sm:$0xc] %vm450_vm1, %v1285_v39  }
  0xdd   :  { %1292 = vst.msk [vmem:[#allocation0 + $0x306] ss:$16 sm:$0x30] %vm450_vm1, %v1285_v39   ;;  %1294 = vst.msk [vmem:[#allocation0 + $0x306] ss:$16 sm:$0xc0] %vm450_vm1, %v1285_v39   ;;  %v3679_v16 = vpop.permute.xlu0 %3678 }
  0xde   :  { %1271 = vst.msk [vmem:[#allocation0 + $0x286] ss:$16 sm:$0x3] %vm450_vm1, %v3616_v37   ;;  %1273 = vst.msk [vmem:[#allocation0 + $0x286] ss:$16 sm:$0xc] %vm450_vm1, %v3616_v37   ;;  %v3681_v17 = vunpack.i.h.bf16 %v3679_v16  ;;  %v3680_v18 = vunpack.i.l.bf16 %v3679_v16  ;;  %v3684_v19 = vpop.permute.xlu1 %3683 }
  0xdf   :  { %1275 = vst.msk [vmem:[#allocation0 + $0x286] ss:$16 sm:$0x30] %vm450_vm1, %v3616_v37   ;;  %1277 = vst.msk [vmem:[#allocation0 + $0x286] ss:$16 sm:$0xc0] %vm450_vm1, %v3616_v37   ;;  %v3686_v20 = vunpack.i.h.bf16 %v3684_v19  ;;  %v3685_v21 = vunpack.i.l.bf16 %v3684_v19 }
  0xe0   :  { %1254 = vst.msk [vmem:[#allocation0 + $0x206] ss:$16 sm:$0x3] %vm450_vm1, %v3615_v38   ;;  %1256 = vst.msk [vmem:[#allocation0 + $0x206] ss:$16 sm:$0xc] %vm450_vm1, %v3615_v38  }
  0xe1   :  { %1258 = vst.msk [vmem:[#allocation0 + $0x206] ss:$16 sm:$0x30] %vm450_vm1, %v3615_v38   ;;  %1260 = vst.msk [vmem:[#allocation0 + $0x206] ss:$16 sm:$0xc0] %vm450_vm1, %v3615_v38   ;;  %v3689_v22 = vpop.permute.xlu0 %3688 }
  0xe2   :  { %1321 = vst.msk [vmem:[#allocation0 + $0x87] ss:$16 sm:$0x3] %vm450_vm1, %v3621_v41   ;;  %1323 = vst.msk [vmem:[#allocation0 + $0x87] ss:$16 sm:$0xc] %vm450_vm1, %v3621_v41   ;;  %v3691_v23 = vunpack.i.h.bf16 %v3689_v22  ;;  %v3690_v24 = vunpack.i.l.bf16 %v3689_v22  ;;  %v1875_v25 = vpop.permute.xlu1 %1874  }
  0xe3   :  { %1325 = vst.msk [vmem:[#allocation0 + $0x87] ss:$16 sm:$0x30] %vm450_vm1, %v3621_v41   ;;  %1327 = vst.msk [vmem:[#allocation0 + $0x87] ss:$16 sm:$0xc0] %vm450_vm1, %v3621_v41  }
  0xe4   :  { %1304 = vst.msk [vmem:[#allocation0 + $0x7] ss:$16 sm:$0x3] %vm450_vm1, %v3620_v42   ;;  %1306 = vst.msk [vmem:[#allocation0 + $0x7] ss:$16 sm:$0xc] %vm450_vm1, %v3620_v42  }
  0xe5   :  { %1308 = vst.msk [vmem:[#allocation0 + $0x7] ss:$16 sm:$0x30] %vm450_vm1, %v3620_v42   ;;  %1310 = vst.msk [vmem:[#allocation0 + $0x7] ss:$16 sm:$0xc0] %vm450_vm1, %v3620_v42   ;;  %v3694_v26 = vpop.permute.xlu0 %3693 }
  0xe6   :  { %1355 = vst.msk [vmem:[#allocation0 + $0x187] ss:$16 sm:$0x3] %vm450_vm1, %v3626_v44   ;;  %1357 = vst.msk [vmem:[#allocation0 + $0x187] ss:$16 sm:$0xc] %vm450_vm1, %v3626_v44   ;;  %v3696_v27 = vunpack.i.h.bf16 %v3694_v26  ;;  %v3695_v28 = vunpack.i.l.bf16 %v3694_v26  ;;  %v3699_v29 = vpop.permute.xlu1 %3698 }
  0xe7   :  { %1359 = vst.msk [vmem:[#allocation0 + $0x187] ss:$16 sm:$0x30] %vm450_vm1, %v3626_v44   ;;  %1361 = vst.msk [vmem:[#allocation0 + $0x187] ss:$16 sm:$0xc0] %vm450_vm1, %v3626_v44   ;;  %v3701_v30 = vunpack.i.h.bf16 %v3699_v29  ;;  %v3700_v31 = vunpack.i.l.bf16 %v3699_v29 }
  0xe8   :  { %1338 = vst.msk [vmem:[#allocation0 + $0x107] ss:$16 sm:$0x3] %vm450_vm1, %v3625_v45   ;;  %1340 = vst.msk [vmem:[#allocation0 + $0x107] ss:$16 sm:$0xc] %vm450_vm1, %v3625_v45  }
  0xe9   :  { %1342 = vst.msk [vmem:[#allocation0 + $0x107] ss:$16 sm:$0x30] %vm450_vm1, %v3625_v45   ;;  %1344 = vst.msk [vmem:[#allocation0 + $0x107] ss:$16 sm:$0xc0] %vm450_vm1, %v3625_v45   ;;  %v3704_v32 = vpop.permute.xlu0 %3703 }
  0xea   :  { %1406 = vst.msk [vmem:[#allocation0 + $0x307] ss:$16 sm:$0x3] %vm450_vm1, %v1403_v49   ;;  %1408 = vst.msk [vmem:[#allocation0 + $0x307] ss:$16 sm:$0xc] %vm450_vm1, %v1403_v49   ;;  %v3706_v33 = vunpack.i.h.bf16 %v3704_v32  ;;  %v3705_v34 = vunpack.i.l.bf16 %v3704_v32  ;;  %v1993_v35 = vpop.permute.xlu1 %1992  }
  0xeb   :  { %1410 = vst.msk [vmem:[#allocation0 + $0x307] ss:$16 sm:$0x30] %vm450_vm1, %v1403_v49   ;;  %1412 = vst.msk [vmem:[#allocation0 + $0x307] ss:$16 sm:$0xc0] %vm450_vm1, %v1403_v49  }
  0xec   :  { %1389 = vst.msk [vmem:[#allocation0 + $0x287] ss:$16 sm:$0x3] %vm450_vm1, %v3631_v47   ;;  %1391 = vst.msk [vmem:[#allocation0 + $0x287] ss:$16 sm:$0xc] %vm450_vm1, %v3631_v47  }
  0xed   :  { %1393 = vst.msk [vmem:[#allocation0 + $0x287] ss:$16 sm:$0x30] %vm450_vm1, %v3631_v47   ;;  %1395 = vst.msk [vmem:[#allocation0 + $0x287] ss:$16 sm:$0xc0] %vm450_vm1, %v3631_v47   ;;  %v3709_v36 = vpop.permute.xlu0 %3708 }
  0xee   :  { %1372 = vst.msk [vmem:[#allocation0 + $0x207] ss:$16 sm:$0x3] %vm450_vm1, %v3630_v48   ;;  %1374 = vst.msk [vmem:[#allocation0 + $0x207] ss:$16 sm:$0xc] %vm450_vm1, %v3630_v48   ;;  %v3711_v37 = vunpack.i.h.bf16 %v3709_v36  ;;  %v3710_v38 = vunpack.i.l.bf16 %v3709_v36  ;;  %v3714_v39 = vpop.permute.xlu1 %3713 }
  0xef   :  { %1376 = vst.msk [vmem:[#allocation0 + $0x207] ss:$16 sm:$0x30] %vm450_vm1, %v3630_v48   ;;  %1378 = vst.msk [vmem:[#allocation0 + $0x207] ss:$16 sm:$0xc0] %vm450_vm1, %v3630_v48   ;;  %v3716_v40 = vunpack.i.h.bf16 %v3714_v39  ;;  %v3715_v41 = vunpack.i.l.bf16 %v3714_v39 }
  0xf0   :  { %1439 = vst.msk [vmem:[#allocation0 + $0x88] ss:$16 sm:$0x3] %vm450_vm1, %v3636_v51   ;;  %1441 = vst.msk [vmem:[#allocation0 + $0x88] ss:$16 sm:$0xc] %vm450_vm1, %v3636_v51  }
  0xf1   :  { %1443 = vst.msk [vmem:[#allocation0 + $0x88] ss:$16 sm:$0x30] %vm450_vm1, %v3636_v51   ;;  %1445 = vst.msk [vmem:[#allocation0 + $0x88] ss:$16 sm:$0xc0] %vm450_vm1, %v3636_v51   ;;  %v3719_v42 = vpop.permute.xlu0 %3718 }
  0xf2   :  { %1422 = vst.msk [vmem:[#allocation0 + $0x8] ss:$16 sm:$0x3] %vm450_vm1, %v3635_v52   ;;  %1424 = vst.msk [vmem:[#allocation0 + $0x8] ss:$16 sm:$0xc] %vm450_vm1, %v3635_v52   ;;  %v3721_v43 = vunpack.i.h.bf16 %v3719_v42  ;;  %v3720_v44 = vunpack.i.l.bf16 %v3719_v42  ;;  %v2111_v45 = vpop.permute.xlu1 %2110  }
  0xf3   :  { %1426 = vst.msk [vmem:[#allocation0 + $0x8] ss:$16 sm:$0x30] %vm450_vm1, %v3635_v52   ;;  %1428 = vst.msk [vmem:[#allocation0 + $0x8] ss:$16 sm:$0xc0] %vm450_vm1, %v3635_v52  }
  0xf4   :  { %1473 = vst.msk [vmem:[#allocation0 + $0x188] ss:$16 sm:$0x3] %vm450_vm1, %v3641_v54   ;;  %1475 = vst.msk [vmem:[#allocation0 + $0x188] ss:$16 sm:$0xc] %vm450_vm1, %v3641_v54  }
  0xf5   :  { %1477 = vst.msk [vmem:[#allocation0 + $0x188] ss:$16 sm:$0x30] %vm450_vm1, %v3641_v54   ;;  %1479 = vst.msk [vmem:[#allocation0 + $0x188] ss:$16 sm:$0xc0] %vm450_vm1, %v3641_v54  }
  0xf6   :  { %1456 = vst.msk [vmem:[#allocation0 + $0x108] ss:$16 sm:$0x3] %vm450_vm1, %v3640_v55   ;;  %1458 = vst.msk [vmem:[#allocation0 + $0x108] ss:$16 sm:$0xc] %vm450_vm1, %v3640_v55  }
  0xf7   :  { %1460 = vst.msk [vmem:[#allocation0 + $0x108] ss:$16 sm:$0x30] %vm450_vm1, %v3640_v55   ;;  %1462 = vst.msk [vmem:[#allocation0 + $0x108] ss:$16 sm:$0xc0] %vm450_vm1, %v3640_v55  }
  0xf8   :  { %1524 = vst.msk [vmem:[#allocation0 + $0x308] ss:$16 sm:$0x3] %vm450_vm1, %v1521_v59   ;;  %1526 = vst.msk [vmem:[#allocation0 + $0x308] ss:$16 sm:$0xc] %vm450_vm1, %v1521_v59  }
  0xf9   :  { %1528 = vst.msk [vmem:[#allocation0 + $0x308] ss:$16 sm:$0x30] %vm450_vm1, %v1521_v59   ;;  %1530 = vst.msk [vmem:[#allocation0 + $0x308] ss:$16 sm:$0xc0] %vm450_vm1, %v1521_v59  }
  0xfa   :  { %1507 = vst.msk [vmem:[#allocation0 + $0x288] ss:$16 sm:$0x3] %vm450_vm1, %v3646_v57   ;;  %1509 = vst.msk [vmem:[#allocation0 + $0x288] ss:$16 sm:$0xc] %vm450_vm1, %v3646_v57  }
  0xfb   :  { %1511 = vst.msk [vmem:[#allocation0 + $0x288] ss:$16 sm:$0x30] %vm450_vm1, %v3646_v57   ;;  %1513 = vst.msk [vmem:[#allocation0 + $0x288] ss:$16 sm:$0xc0] %vm450_vm1, %v3646_v57  }
  0xfc   :  { %1490 = vst.msk [vmem:[#allocation0 + $0x208] ss:$16 sm:$0x3] %vm450_vm1, %v3645_v58   ;;  %1492 = vst.msk [vmem:[#allocation0 + $0x208] ss:$16 sm:$0xc] %vm450_vm1, %v3645_v58  }
  0xfd   :  { %1494 = vst.msk [vmem:[#allocation0 + $0x208] ss:$16 sm:$0x30] %vm450_vm1, %v3645_v58   ;;  %1496 = vst.msk [vmem:[#allocation0 + $0x208] ss:$16 sm:$0xc0] %vm450_vm1, %v3645_v58  }
  0xfe   :  { %1557 = vst.msk [vmem:[#allocation0 + $0x89] ss:$16 sm:$0x3] %vm450_vm1, %v3651_v61   ;;  %1559 = vst.msk [vmem:[#allocation0 + $0x89] ss:$16 sm:$0xc] %vm450_vm1, %v3651_v61  }
  0xff   :  { %1561 = vst.msk [vmem:[#allocation0 + $0x89] ss:$16 sm:$0x30] %vm450_vm1, %v3651_v61   ;;  %1563 = vst.msk [vmem:[#allocation0 + $0x89] ss:$16 sm:$0xc0] %vm450_vm1, %v3651_v61  }
 0x100   :  { %1540 = vst.msk [vmem:[#allocation0 + $0x9] ss:$16 sm:$0x3] %vm450_vm1, %v3650_v62   ;;  %1542 = vst.msk [vmem:[#allocation0 + $0x9] ss:$16 sm:$0xc] %vm450_vm1, %v3650_v62  }
 0x101   :  { %1544 = vst.msk [vmem:[#allocation0 + $0x9] ss:$16 sm:$0x30] %vm450_vm1, %v3650_v62   ;;  %1546 = vst.msk [vmem:[#allocation0 + $0x9] ss:$16 sm:$0xc0] %vm450_vm1, %v3650_v62  }
 0x102   :  { %1591 = vst.msk [vmem:[#allocation0 + $0x189] ss:$16 sm:$0x3] %vm450_vm1, %v3656_v0   ;;  %1593 = vst.msk [vmem:[#allocation0 + $0x189] ss:$16 sm:$0xc] %vm450_vm1, %v3656_v0  }
 0x103   :  { %1595 = vst.msk [vmem:[#allocation0 + $0x189] ss:$16 sm:$0x30] %vm450_vm1, %v3656_v0   ;;  %1597 = vst.msk [vmem:[#allocation0 + $0x189] ss:$16 sm:$0xc0] %vm450_vm1, %v3656_v0  }
 0x104   :  { %1574 = vst.msk [vmem:[#allocation0 + $0x109] ss:$16 sm:$0x3] %vm450_vm1, %v3655_v1   ;;  %1576 = vst.msk [vmem:[#allocation0 + $0x109] ss:$16 sm:$0xc] %vm450_vm1, %v3655_v1  }
 0x105   :  { %1578 = vst.msk [vmem:[#allocation0 + $0x109] ss:$16 sm:$0x30] %vm450_vm1, %v3655_v1   ;;  %1580 = vst.msk [vmem:[#allocation0 + $0x109] ss:$16 sm:$0xc0] %vm450_vm1, %v3655_v1  }
 0x106   :  { %1642 = vst.msk [vmem:[#allocation0 + $0x309] ss:$16 sm:$0x3] %vm450_vm1, %v1639_v5   ;;  %1644 = vst.msk [vmem:[#allocation0 + $0x309] ss:$16 sm:$0xc] %vm450_vm1, %v1639_v5  }
 0x107   :  { %1646 = vst.msk [vmem:[#allocation0 + $0x309] ss:$16 sm:$0x30] %vm450_vm1, %v1639_v5   ;;  %1648 = vst.msk [vmem:[#allocation0 + $0x309] ss:$16 sm:$0xc0] %vm450_vm1, %v1639_v5  }
 0x108   :  { %1625 = vst.msk [vmem:[#allocation0 + $0x289] ss:$16 sm:$0x3] %vm450_vm1, %v3661_v3   ;;  %1627 = vst.msk [vmem:[#allocation0 + $0x289] ss:$16 sm:$0xc] %vm450_vm1, %v3661_v3  }
 0x109   :  { %1629 = vst.msk [vmem:[#allocation0 + $0x289] ss:$16 sm:$0x30] %vm450_vm1, %v3661_v3   ;;  %1631 = vst.msk [vmem:[#allocation0 + $0x289] ss:$16 sm:$0xc0] %vm450_vm1, %v3661_v3  }
 0x10a   :  { %1608 = vst.msk [vmem:[#allocation0 + $0x209] ss:$16 sm:$0x3] %vm450_vm1, %v3660_v4   ;;  %1610 = vst.msk [vmem:[#allocation0 + $0x209] ss:$16 sm:$0xc] %vm450_vm1, %v3660_v4  }
 0x10b   :  { %1612 = vst.msk [vmem:[#allocation0 + $0x209] ss:$16 sm:$0x30] %vm450_vm1, %v3660_v4   ;;  %1614 = vst.msk [vmem:[#allocation0 + $0x209] ss:$16 sm:$0xc0] %vm450_vm1, %v3660_v4  }
 0x10c   :  { %1675 = vst.msk [vmem:[#allocation0 + $0x8a] ss:$16 sm:$0x3] %vm450_vm1, %v3666_v7   ;;  %1677 = vst.msk [vmem:[#allocation0 + $0x8a] ss:$16 sm:$0xc] %vm450_vm1, %v3666_v7  }
 0x10d   :  { %1679 = vst.msk [vmem:[#allocation0 + $0x8a] ss:$16 sm:$0x30] %vm450_vm1, %v3666_v7   ;;  %1681 = vst.msk [vmem:[#allocation0 + $0x8a] ss:$16 sm:$0xc0] %vm450_vm1, %v3666_v7  }
 0x10e   :  { %1658 = vst.msk [vmem:[#allocation0 + $0xa] ss:$16 sm:$0x3] %vm450_vm1, %v3665_v8   ;;  %1660 = vst.msk [vmem:[#allocation0 + $0xa] ss:$16 sm:$0xc] %vm450_vm1, %v3665_v8  }
 0x10f   :  { %1662 = vst.msk [vmem:[#allocation0 + $0xa] ss:$16 sm:$0x30] %vm450_vm1, %v3665_v8   ;;  %1664 = vst.msk [vmem:[#allocation0 + $0xa] ss:$16 sm:$0xc0] %vm450_vm1, %v3665_v8  }
 0x110   :  { %1709 = vst.msk [vmem:[#allocation0 + $0x18a] ss:$16 sm:$0x3] %vm450_vm1, %v3671_v10   ;;  %1711 = vst.msk [vmem:[#allocation0 + $0x18a] ss:$16 sm:$0xc] %vm450_vm1, %v3671_v10  }
 0x111   :  { %1713 = vst.msk [vmem:[#allocation0 + $0x18a] ss:$16 sm:$0x30] %vm450_vm1, %v3671_v10   ;;  %1715 = vst.msk [vmem:[#allocation0 + $0x18a] ss:$16 sm:$0xc0] %vm450_vm1, %v3671_v10  }
 0x112   :  { %1692 = vst.msk [vmem:[#allocation0 + $0x10a] ss:$16 sm:$0x3] %vm450_vm1, %v3670_v11   ;;  %1694 = vst.msk [vmem:[#allocation0 + $0x10a] ss:$16 sm:$0xc] %vm450_vm1, %v3670_v11  }
 0x113   :  { %1696 = vst.msk [vmem:[#allocation0 + $0x10a] ss:$16 sm:$0x30] %vm450_vm1, %v3670_v11   ;;  %1698 = vst.msk [vmem:[#allocation0 + $0x10a] ss:$16 sm:$0xc0] %vm450_vm1, %v3670_v11  }
 0x114   :  { %1760 = vst.msk [vmem:[#allocation0 + $0x30a] ss:$16 sm:$0x3] %vm450_vm1, %v1757_v15   ;;  %1762 = vst.msk [vmem:[#allocation0 + $0x30a] ss:$16 sm:$0xc] %vm450_vm1, %v1757_v15  }
 0x115   :  { %1764 = vst.msk [vmem:[#allocation0 + $0x30a] ss:$16 sm:$0x30] %vm450_vm1, %v1757_v15   ;;  %1766 = vst.msk [vmem:[#allocation0 + $0x30a] ss:$16 sm:$0xc0] %vm450_vm1, %v1757_v15  }
 0x116   :  { %1743 = vst.msk [vmem:[#allocation0 + $0x28a] ss:$16 sm:$0x3] %vm450_vm1, %v3676_v13   ;;  %1745 = vst.msk [vmem:[#allocation0 + $0x28a] ss:$16 sm:$0xc] %vm450_vm1, %v3676_v13  }
 0x117   :  { %1747 = vst.msk [vmem:[#allocation0 + $0x28a] ss:$16 sm:$0x30] %vm450_vm1, %v3676_v13   ;;  %1749 = vst.msk [vmem:[#allocation0 + $0x28a] ss:$16 sm:$0xc0] %vm450_vm1, %v3676_v13  }
 0x118   :  { %1726 = vst.msk [vmem:[#allocation0 + $0x20a] ss:$16 sm:$0x3] %vm450_vm1, %v3675_v14   ;;  %1728 = vst.msk [vmem:[#allocation0 + $0x20a] ss:$16 sm:$0xc] %vm450_vm1, %v3675_v14  }
 0x119   :  { %1730 = vst.msk [vmem:[#allocation0 + $0x20a] ss:$16 sm:$0x30] %vm450_vm1, %v3675_v14   ;;  %1732 = vst.msk [vmem:[#allocation0 + $0x20a] ss:$16 sm:$0xc0] %vm450_vm1, %v3675_v14  }
 0x11a   :  { %1793 = vst.msk [vmem:[#allocation0 + $0x8b] ss:$16 sm:$0x3] %vm450_vm1, %v3681_v17   ;;  %1795 = vst.msk [vmem:[#allocation0 + $0x8b] ss:$16 sm:$0xc] %vm450_vm1, %v3681_v17  }
 0x11b   :  { %1797 = vst.msk [vmem:[#allocation0 + $0x8b] ss:$16 sm:$0x30] %vm450_vm1, %v3681_v17   ;;  %1799 = vst.msk [vmem:[#allocation0 + $0x8b] ss:$16 sm:$0xc0] %vm450_vm1, %v3681_v17  }
 0x11c   :  { %1776 = vst.msk [vmem:[#allocation0 + $0xb] ss:$16 sm:$0x3] %vm450_vm1, %v3680_v18   ;;  %1778 = vst.msk [vmem:[#allocation0 + $0xb] ss:$16 sm:$0xc] %vm450_vm1, %v3680_v18  }
 0x11d   :  { %1780 = vst.msk [vmem:[#allocation0 + $0xb] ss:$16 sm:$0x30] %vm450_vm1, %v3680_v18   ;;  %1782 = vst.msk [vmem:[#allocation0 + $0xb] ss:$16 sm:$0xc0] %vm450_vm1, %v3680_v18  }
 0x11e   :  { %1827 = vst.msk [vmem:[#allocation0 + $0x18b] ss:$16 sm:$0x3] %vm450_vm1, %v3686_v20   ;;  %1829 = vst.msk [vmem:[#allocation0 + $0x18b] ss:$16 sm:$0xc] %vm450_vm1, %v3686_v20  }
 0x11f   :  { %1831 = vst.msk [vmem:[#allocation0 + $0x18b] ss:$16 sm:$0x30] %vm450_vm1, %v3686_v20   ;;  %1833 = vst.msk [vmem:[#allocation0 + $0x18b] ss:$16 sm:$0xc0] %vm450_vm1, %v3686_v20  }
 0x120   :  { %1810 = vst.msk [vmem:[#allocation0 + $0x10b] ss:$16 sm:$0x3] %vm450_vm1, %v3685_v21   ;;  %1812 = vst.msk [vmem:[#allocation0 + $0x10b] ss:$16 sm:$0xc] %vm450_vm1, %v3685_v21  }
 0x121   :  { %1814 = vst.msk [vmem:[#allocation0 + $0x10b] ss:$16 sm:$0x30] %vm450_vm1, %v3685_v21   ;;  %1816 = vst.msk [vmem:[#allocation0 + $0x10b] ss:$16 sm:$0xc0] %vm450_vm1, %v3685_v21  }
 0x122   :  { %1878 = vst.msk [vmem:[#allocation0 + $0x30b] ss:$16 sm:$0x3] %vm450_vm1, %v1875_v25   ;;  %1880 = vst.msk [vmem:[#allocation0 + $0x30b] ss:$16 sm:$0xc] %vm450_vm1, %v1875_v25  }
 0x123   :  { %1882 = vst.msk [vmem:[#allocation0 + $0x30b] ss:$16 sm:$0x30] %vm450_vm1, %v1875_v25   ;;  %1884 = vst.msk [vmem:[#allocation0 + $0x30b] ss:$16 sm:$0xc0] %vm450_vm1, %v1875_v25  }
 0x124   :  { %1861 = vst.msk [vmem:[#allocation0 + $0x28b] ss:$16 sm:$0x3] %vm450_vm1, %v3691_v23   ;;  %1863 = vst.msk [vmem:[#allocation0 + $0x28b] ss:$16 sm:$0xc] %vm450_vm1, %v3691_v23  }
 0x125   :  { %1865 = vst.msk [vmem:[#allocation0 + $0x28b] ss:$16 sm:$0x30] %vm450_vm1, %v3691_v23   ;;  %1867 = vst.msk [vmem:[#allocation0 + $0x28b] ss:$16 sm:$0xc0] %vm450_vm1, %v3691_v23  }
 0x126   :  { %1844 = vst.msk [vmem:[#allocation0 + $0x20b] ss:$16 sm:$0x3] %vm450_vm1, %v3690_v24   ;;  %1846 = vst.msk [vmem:[#allocation0 + $0x20b] ss:$16 sm:$0xc] %vm450_vm1, %v3690_v24  }
 0x127   :  { %1848 = vst.msk [vmem:[#allocation0 + $0x20b] ss:$16 sm:$0x30] %vm450_vm1, %v3690_v24   ;;  %1850 = vst.msk [vmem:[#allocation0 + $0x20b] ss:$16 sm:$0xc0] %vm450_vm1, %v3690_v24  }
 0x128   :  { %1911 = vst.msk [vmem:[#allocation0 + $0x8c] ss:$16 sm:$0x3] %vm450_vm1, %v3696_v27   ;;  %1913 = vst.msk [vmem:[#allocation0 + $0x8c] ss:$16 sm:$0xc] %vm450_vm1, %v3696_v27  }
 0x129   :  { %1915 = vst.msk [vmem:[#allocation0 + $0x8c] ss:$16 sm:$0x30] %vm450_vm1, %v3696_v27   ;;  %1917 = vst.msk [vmem:[#allocation0 + $0x8c] ss:$16 sm:$0xc0] %vm450_vm1, %v3696_v27  }
 0x12a   :  { %1894 = vst.msk [vmem:[#allocation0 + $0xc] ss:$16 sm:$0x3] %vm450_vm1, %v3695_v28   ;;  %1896 = vst.msk [vmem:[#allocation0 + $0xc] ss:$16 sm:$0xc] %vm450_vm1, %v3695_v28  }
 0x12b   :  { %1898 = vst.msk [vmem:[#allocation0 + $0xc] ss:$16 sm:$0x30] %vm450_vm1, %v3695_v28   ;;  %1900 = vst.msk [vmem:[#allocation0 + $0xc] ss:$16 sm:$0xc0] %vm450_vm1, %v3695_v28  }
 0x12c   :  { %1945 = vst.msk [vmem:[#allocation0 + $0x18c] ss:$16 sm:$0x3] %vm450_vm1, %v3701_v30   ;;  %1947 = vst.msk [vmem:[#allocation0 + $0x18c] ss:$16 sm:$0xc] %vm450_vm1, %v3701_v30  }
 0x12d   :  { %1949 = vst.msk [vmem:[#allocation0 + $0x18c] ss:$16 sm:$0x30] %vm450_vm1, %v3701_v30   ;;  %1951 = vst.msk [vmem:[#allocation0 + $0x18c] ss:$16 sm:$0xc0] %vm450_vm1, %v3701_v30  }
 0x12e   :  { %1928 = vst.msk [vmem:[#allocation0 + $0x10c] ss:$16 sm:$0x3] %vm450_vm1, %v3700_v31   ;;  %1930 = vst.msk [vmem:[#allocation0 + $0x10c] ss:$16 sm:$0xc] %vm450_vm1, %v3700_v31  }
 0x12f   :  { %1932 = vst.msk [vmem:[#allocation0 + $0x10c] ss:$16 sm:$0x30] %vm450_vm1, %v3700_v31   ;;  %1934 = vst.msk [vmem:[#allocation0 + $0x10c] ss:$16 sm:$0xc0] %vm450_vm1, %v3700_v31  }
 0x130   :  { %1996 = vst.msk [vmem:[#allocation0 + $0x30c] ss:$16 sm:$0x3] %vm450_vm1, %v1993_v35   ;;  %1998 = vst.msk [vmem:[#allocation0 + $0x30c] ss:$16 sm:$0xc] %vm450_vm1, %v1993_v35  }
 0x131   :  { %2000 = vst.msk [vmem:[#allocation0 + $0x30c] ss:$16 sm:$0x30] %vm450_vm1, %v1993_v35   ;;  %2002 = vst.msk [vmem:[#allocation0 + $0x30c] ss:$16 sm:$0xc0] %vm450_vm1, %v1993_v35  }
 0x132   :  { %1979 = vst.msk [vmem:[#allocation0 + $0x28c] ss:$16 sm:$0x3] %vm450_vm1, %v3706_v33   ;;  %1981 = vst.msk [vmem:[#allocation0 + $0x28c] ss:$16 sm:$0xc] %vm450_vm1, %v3706_v33  }
 0x133   :  { %1983 = vst.msk [vmem:[#allocation0 + $0x28c] ss:$16 sm:$0x30] %vm450_vm1, %v3706_v33   ;;  %1985 = vst.msk [vmem:[#allocation0 + $0x28c] ss:$16 sm:$0xc0] %vm450_vm1, %v3706_v33  }
 0x134   :  { %1962 = vst.msk [vmem:[#allocation0 + $0x20c] ss:$16 sm:$0x3] %vm450_vm1, %v3705_v34   ;;  %1964 = vst.msk [vmem:[#allocation0 + $0x20c] ss:$16 sm:$0xc] %vm450_vm1, %v3705_v34  }
 0x135   :  { %1966 = vst.msk [vmem:[#allocation0 + $0x20c] ss:$16 sm:$0x30] %vm450_vm1, %v3705_v34   ;;  %1968 = vst.msk [vmem:[#allocation0 + $0x20c] ss:$16 sm:$0xc0] %vm450_vm1, %v3705_v34  }
 0x136   :  { %2029 = vst.msk [vmem:[#allocation0 + $0x8d] ss:$16 sm:$0x3] %vm450_vm1, %v3711_v37   ;;  %2031 = vst.msk [vmem:[#allocation0 + $0x8d] ss:$16 sm:$0xc] %vm450_vm1, %v3711_v37  }
 0x137   :  { %2033 = vst.msk [vmem:[#allocation0 + $0x8d] ss:$16 sm:$0x30] %vm450_vm1, %v3711_v37   ;;  %2035 = vst.msk [vmem:[#allocation0 + $0x8d] ss:$16 sm:$0xc0] %vm450_vm1, %v3711_v37  }
 0x138   :  { %2012 = vst.msk [vmem:[#allocation0 + $0xd] ss:$16 sm:$0x3] %vm450_vm1, %v3710_v38   ;;  %2014 = vst.msk [vmem:[#allocation0 + $0xd] ss:$16 sm:$0xc] %vm450_vm1, %v3710_v38  }
 0x139   :  { %2016 = vst.msk [vmem:[#allocation0 + $0xd] ss:$16 sm:$0x30] %vm450_vm1, %v3710_v38   ;;  %2018 = vst.msk [vmem:[#allocation0 + $0xd] ss:$16 sm:$0xc0] %vm450_vm1, %v3710_v38  }
 0x13a   :  { %2063 = vst.msk [vmem:[#allocation0 + $0x18d] ss:$16 sm:$0x3] %vm450_vm1, %v3716_v40   ;;  %2065 = vst.msk [vmem:[#allocation0 + $0x18d] ss:$16 sm:$0xc] %vm450_vm1, %v3716_v40  }
 0x13b   :  { %2067 = vst.msk [vmem:[#allocation0 + $0x18d] ss:$16 sm:$0x30] %vm450_vm1, %v3716_v40   ;;  %2069 = vst.msk [vmem:[#allocation0 + $0x18d] ss:$16 sm:$0xc0] %vm450_vm1, %v3716_v40  }
 0x13c   :  { %2046 = vst.msk [vmem:[#allocation0 + $0x10d] ss:$16 sm:$0x3] %vm450_vm1, %v3715_v41   ;;  %2048 = vst.msk [vmem:[#allocation0 + $0x10d] ss:$16 sm:$0xc] %vm450_vm1, %v3715_v41  }
 0x13d   :  { %2050 = vst.msk [vmem:[#allocation0 + $0x10d] ss:$16 sm:$0x30] %vm450_vm1, %v3715_v41   ;;  %2052 = vst.msk [vmem:[#allocation0 + $0x10d] ss:$16 sm:$0xc0] %vm450_vm1, %v3715_v41  }
 0x13e   :  { %2114 = vst.msk [vmem:[#allocation0 + $0x30d] ss:$16 sm:$0x3] %vm450_vm1, %v2111_v45   ;;  %2116 = vst.msk [vmem:[#allocation0 + $0x30d] ss:$16 sm:$0xc] %vm450_vm1, %v2111_v45  }
 0x13f   :  { %2118 = vst.msk [vmem:[#allocation0 + $0x30d] ss:$16 sm:$0x30] %vm450_vm1, %v2111_v45   ;;  %2120 = vst.msk [vmem:[#allocation0 + $0x30d] ss:$16 sm:$0xc0] %vm450_vm1, %v2111_v45  }
 0x140   :  { %2097 = vst.msk [vmem:[#allocation0 + $0x28d] ss:$16 sm:$0x3] %vm450_vm1, %v3721_v43   ;;  %2099 = vst.msk [vmem:[#allocation0 + $0x28d] ss:$16 sm:$0xc] %vm450_vm1, %v3721_v43  }
 0x141   :  { %2101 = vst.msk [vmem:[#allocation0 + $0x28d] ss:$16 sm:$0x30] %vm450_vm1, %v3721_v43   ;;  %2103 = vst.msk [vmem:[#allocation0 + $0x28d] ss:$16 sm:$0xc0] %vm450_vm1, %v3721_v43  }
 0x142   :  { %2080 = vst.msk [vmem:[#allocation0 + $0x20d] ss:$16 sm:$0x3] %vm450_vm1, %v3720_v44   ;;  %2082 = vst.msk [vmem:[#allocation0 + $0x20d] ss:$16 sm:$0xc] %vm450_vm1, %v3720_v44  }
 0x143   :  { %2084 = vst.msk [vmem:[#allocation0 + $0x20d] ss:$16 sm:$0x30] %vm450_vm1, %v3720_v44   ;;  %2086 = vst.msk [vmem:[#allocation0 + $0x20d] ss:$16 sm:$0xc0] %vm450_vm1, %v3720_v44  }
 0x144   :  { %v2150_v46 = vld [vmem:[#allocation0 + $0x20] sm:$0xff]  ;;  %v2164_v47 = vld [vmem:[#allocation0 + $0x30] sm:$0xff]  ;;  %v2130_v55 = vld [vmem:[#allocation0 + $0x8] sm:$0xff] }
 0x145   :  { %v2178_v48 = vld [vmem:[#allocation0 + $0x40] sm:$0xff]  ;;  %v2192_v49 = vld [vmem:[#allocation0 + $0x50] sm:$0xff]  ;;  %v2143_v56 = vld [vmem:[#allocation0 + $0x18] sm:$0xff] }
 0x146   :  { %v2125_v50 = vld [vmem:[#allocation0] sm:$0xff]  ;;  %v2136_v51 = vld [vmem:[#allocation0 + $0x10] sm:$0xff]  ;;  %v2157_v57 = vld [vmem:[#allocation0 + $0x28] sm:$0xff] }
 0x147   :  { %v2206_v52 = vld [vmem:[#allocation0 + $0x60] sm:$0xff]  ;;  %v2220_v53 = vld [vmem:[#allocation0 + $0x70] sm:$0xff]  ;;  %v2171_v61 = vld [vmem:[#allocation0 + $0x38] sm:$0xff]  ;;  %v3182_v0 = vpack.c.bf16 %v2130_v55, %v2125_v50  ;;  %v3187_v1 = vpack.c.bf16 %v2143_v56, %v2136_v51  ;;  %v3192_v2 = vpack.c.bf16 %v2157_v57, %v2150_v46 }
 0x148   :  { %v2234_v54 = vld [vmem:[#allocation0 + $0x80] sm:$0xff]  ;;  %v4288_v58 = vld [vmem:[#allocation0 + $0x90] sm:$0xff]  ;;  %v2185_v62 = vld [vmem:[#allocation0 + $0x48] sm:$0xff]  ;;  %v3197_v9 = vpack.c.bf16 %v2171_v61, %v2164_v47 }
 0x149   :  { %v4290_v59 = vld [vmem:[#allocation0 + $0xa0] sm:$0xff]  ;;  %v4292_v60 = vld [vmem:[#allocation0 + $0xb0] sm:$0xff]  ;;  %v2199_v63 = vld [vmem:[#allocation0 + $0x58] sm:$0xff]  ;;  %v3202_v10 = vpack.c.bf16 %v2185_v62, %v2178_v48  ;;  %3183 = vst [vmem:[%s4514_s1] sm:$0xff] %v3182_v0  }
 0x14a   :  { %v4294_v3 = vld [vmem:[#allocation0 + $0xc0] sm:$0xff]  ;;  %v4296_v4 = vld [vmem:[#allocation0 + $0xd0] sm:$0xff]  ;;  %v2213_v6 = vld [vmem:[#allocation0 + $0x68] sm:$0xff]  ;;  %v3207_v11 = vpack.c.bf16 %v2199_v63, %v2192_v49  ;;  %3459 = vst [vmem:[%s4514_s1 + $0x8] sm:$0xff] %v3187_v1  }
 0x14b   :  { %v4298_v5 = vld [vmem:[#allocation0 + $0xe0] sm:$0xff]  ;;  %v2227_v7 = vld [vmem:[#allocation0 + $0x78] sm:$0xff]  ;;  %v2241_v8 = vld [vmem:[#allocation0 + $0x88] sm:$0xff]  ;;  %v3212_v18 = vpack.c.bf16 %v2213_v6, %v2206_v52  ;;  %3460 = vst [vmem:[%s4514_s1 + $0x10] sm:$0xff] %v3192_v2  }
 0x14c   :  { %v4300_v12 = vld [vmem:[#allocation0 + $0xf0] sm:$0xff]  ;;  %v2255_v13 = vld [vmem:[#allocation0 + $0x98] sm:$0xff]  ;;  %v2269_v14 = vld [vmem:[#allocation0 + $0xa8] sm:$0xff]  ;;  %v3217_v19 = vpack.c.bf16 %v2227_v7, %v2220_v53  ;;  %v3222_v20 = vpack.c.bf16 %v2241_v8, %v2234_v54  ;;  %3461 = vst [vmem:[%s4514_s1 + $0x18] sm:$0xff] %v3197_v9  }
 0x14d   :  { %v2283_v15 = vld [vmem:[#allocation0 + $0xb8] sm:$0xff]  ;;  %v2374_v16 = vld [vmem:[#allocation0 + $0x120] sm:$0xff]  ;;  %v2388_v17 = vld [vmem:[#allocation0 + $0x130] sm:$0xff]  ;;  %v3227_v27 = vpack.c.bf16 %v2255_v13, %v4288_v58  ;;  %v3232_v28 = vpack.c.bf16 %v2269_v14, %v4290_v59  ;;  %3462 = vst [vmem:[%s4514_s1 + $0x20] sm:$0xff] %v3202_v10  }
 0x14e   :  { %v4311_v21 = vld [vmem:[#allocation0 + $0x100] sm:$0xff]  ;;  %v2297_v22 = vld [vmem:[#allocation0 + $0xc8] sm:$0xff]  ;;  %v2311_v23 = vld [vmem:[#allocation0 + $0xd8] sm:$0xff]  ;;  %v3237_v29 = vpack.c.bf16 %v2283_v15, %v4292_v60  ;;  %3463 = vst [vmem:[%s4514_s1 + $0x28] sm:$0xff] %v3207_v11  }
 0x14f   :  { %v2325_v24 = vld [vmem:[#allocation0 + $0xe8] sm:$0xff]  ;;  %v2402_v25 = vld [vmem:[#allocation0 + $0x140] sm:$0xff]  ;;  %v2416_v26 = vld [vmem:[#allocation0 + $0x150] sm:$0xff]  ;;  %v3242_v36 = vpack.c.bf16 %v2297_v22, %v4294_v3  ;;  %v3247_v37 = vpack.c.bf16 %v2311_v23, %v4296_v4  ;;  %3464 = vst [vmem:[%s4514_s1 + $0x30] sm:$0xff] %v3212_v18  }
 0x150   :  { %v4325_v30 = vld [vmem:[#allocation0 + $0x160] sm:$0xff]  ;;  %v4327_v31 = vld [vmem:[#allocation0 + $0x170] sm:$0xff]  ;;  %v2339_v33 = vld [vmem:[#allocation0 + $0xf8] sm:$0xff]  ;;  %v3252_v38 = vpack.c.bf16 %v2325_v24, %v4298_v5  ;;  %3465 = vst [vmem:[%s4514_s1 + $0x38] sm:$0xff] %v3217_v19  }
 0x151   :  { %v4329_v32 = vld [vmem:[#allocation0 + $0x110] sm:$0xff]  ;;  %v2381_v34 = vld [vmem:[#allocation0 + $0x128] sm:$0xff]  ;;  %v2395_v35 = vld [vmem:[#allocation0 + $0x138] sm:$0xff]  ;;  %3466 = vst [vmem:[%s4514_s1 + $0x40] sm:$0xff] %v3222_v20   ;;  %v3257_v46 = vpack.c.bf16 %v2339_v33, %v4300_v12 }
 0x152   :  { %v4343_v39 = vld [vmem:[#allocation0 + $0x180] sm:$0xff]  ;;  %v4345_v40 = vld [vmem:[#allocation0 + $0x190] sm:$0xff]  ;;  %v3272_v42 = vpack.c.bf16 %v2381_v34, %v2374_v16  ;;  %v3277_v43 = vpack.c.bf16 %v2395_v35, %v2388_v17  ;;  %v2409_v44 = vld [vmem:[#allocation0 + $0x148] sm:$0xff]  ;;  %3467 = vst [vmem:[%s4514_s1 + $0x48] sm:$0xff] %v3227_v27  }
 0x153   :  { %v4347_v41 = vld [vmem:[#allocation0 + $0x1a0] sm:$0xff]  ;;  %v2423_v45 = vld [vmem:[#allocation0 + $0x158] sm:$0xff]  ;;  %v2353_v47 = vld [vmem:[#allocation0 + $0x108] sm:$0xff]  ;;  %3468 = vst [vmem:[%s4514_s1 + $0x50] sm:$0xff] %v3232_v28   ;;  %v3282_v51 = vpack.c.bf16 %v2409_v44, %v2402_v25 }
 0x154   :  { %3469 = vst [vmem:[%s4514_s1 + $0x58] sm:$0xff] %v3237_v29   ;;  %v4359_v48 = vld [vmem:[#allocation0 + $0x1b0] sm:$0xff]  ;;  %v4361_v49 = vld [vmem:[#allocation0 + $0x1c0] sm:$0xff]  ;;  %v3287_v52 = vpack.c.bf16 %v2423_v45, %v2416_v26  ;;  %v2367_v53 = vld [vmem:[#allocation0 + $0x118] sm:$0xff]  ;;  %v3262_v56 = vpack.c.bf16 %v2353_v47, %v4311_v21 }
 0x155   :  { %v4363_v50 = vld [vmem:[#allocation0 + $0x1d0] sm:$0xff]  ;;  %v2437_v54 = vld [vmem:[#allocation0 + $0x168] sm:$0xff]  ;;  %v2451_v55 = vld [vmem:[#allocation0 + $0x178] sm:$0xff]  ;;  %3470 = vst [vmem:[%s4514_s1 + $0x60] sm:$0xff] %v3242_v36   ;;  %v3267_v63 = vpack.c.bf16 %v2367_v53, %v4329_v32 }
 0x156   :  { %3471 = vst [vmem:[%s4514_s1 + $0x68] sm:$0xff] %v3247_v37   ;;  %3472 = vst [vmem:[%s4514_s1 + $0x70] sm:$0xff] %v3252_v38   ;;  %v4375_v57 = vld [vmem:[#allocation0 + $0x1e0] sm:$0xff]  ;;  %v4377_v58 = vld [vmem:[#allocation0 + $0x1f0] sm:$0xff]  ;;  %v3292_v0 = vpack.c.bf16 %v2437_v54, %v4325_v30  ;;  %v3297_v1 = vpack.c.bf16 %v2451_v55, %v4327_v31 }
 0x157   :  { %3476 = vst [vmem:[%s4514_s1 + $0x90] sm:$0xff] %v3272_v42   ;;  %3477 = vst [vmem:[%s4514_s1 + $0x98] sm:$0xff] %v3277_v43   ;;  %v2465_v59 = vld [vmem:[#allocation0 + $0x188] sm:$0xff]  ;;  %v2479_v60 = vld [vmem:[#allocation0 + $0x198] sm:$0xff] }
 0x158   :  { %v2493_v61 = vld [vmem:[#allocation0 + $0x1a8] sm:$0xff]  ;;  %v2570_v62 = vld [vmem:[#allocation0 + $0x200] sm:$0xff]  ;;  %3473 = vst [vmem:[%s4514_s1 + $0x78] sm:$0xff] %v3257_v46   ;;  %3478 = vst [vmem:[%s4514_s1 + $0xa0] sm:$0xff] %v3282_v51   ;;  %v3302_v8 = vpack.c.bf16 %v2465_v59, %v4343_v39  ;;  %v3307_v9 = vpack.c.bf16 %v2479_v60, %v4345_v40 }
 0x159   :  { %3479 = vst [vmem:[%s4514_s1 + $0xa8] sm:$0xff] %v3287_v52   ;;  %v2507_v2 = vld [vmem:[#allocation0 + $0x1b8] sm:$0xff]  ;;  %v2521_v3 = vld [vmem:[#allocation0 + $0x1c8] sm:$0xff]  ;;  %v2584_v5 = vld [vmem:[#allocation0 + $0x210] sm:$0xff]  ;;  %v3312_v10 = vpack.c.bf16 %v2493_v61, %v4347_v41 }
 0x15a   :  { %v2535_v4 = vld [vmem:[#allocation0 + $0x1d8] sm:$0xff]  ;;  %v2598_v6 = vld [vmem:[#allocation0 + $0x220] sm:$0xff]  ;;  %v2612_v7 = vld [vmem:[#allocation0 + $0x230] sm:$0xff]  ;;  %3474 = vst [vmem:[%s4514_s1 + $0x80] sm:$0xff] %v3262_v56   ;;  %v3317_v17 = vpack.c.bf16 %v2507_v2, %v4359_v48  ;;  %v3322_v18 = vpack.c.bf16 %v2521_v3, %v4361_v49 }
 0x15b   :  { %v2549_v11 = vld [vmem:[#allocation0 + $0x1e8] sm:$0xff]  ;;  %v2563_v12 = vld [vmem:[#allocation0 + $0x1f8] sm:$0xff]  ;;  %v2626_v14 = vld [vmem:[#allocation0 + $0x240] sm:$0xff]  ;;  %v3327_v19 = vpack.c.bf16 %v2535_v4, %v4363_v50  ;;  %3475 = vst [vmem:[%s4514_s1 + $0x88] sm:$0xff] %v3267_v63  }
 0x15c   :  { %v2577_v13 = vld [vmem:[#allocation0 + $0x208] sm:$0xff]  ;;  %v2640_v15 = vld [vmem:[#allocation0 + $0x250] sm:$0xff]  ;;  %v2654_v16 = vld [vmem:[#allocation0 + $0x260] sm:$0xff]  ;;  %3480 = vst [vmem:[%s4514_s1 + $0xb0] sm:$0xff] %v3292_v0   ;;  %v3332_v27 = vpack.c.bf16 %v2549_v11, %v4375_v57  ;;  %v3337_v28 = vpack.c.bf16 %v2563_v12, %v4377_v58 }
 0x15d   :  { %3481 = vst [vmem:[%s4514_s1 + $0xb8] sm:$0xff] %v3297_v1   ;;  %v3342_v20 = vpack.c.bf16 %v2577_v13, %v2570_v62  ;;  %v2591_v21 = vld [vmem:[#allocation0 + $0x218] sm:$0xff]  ;;  %v2605_v22 = vld [vmem:[#allocation0 + $0x228] sm:$0xff]  ;;  %v2668_v24 = vld [vmem:[#allocation0 + $0x270] sm:$0xff] }
 0x15e   :  { %v2619_v23 = vld [vmem:[#allocation0 + $0x238] sm:$0xff]  ;;  %v2682_v25 = vld [vmem:[#allocation0 + $0x280] sm:$0xff]  ;;  %v2696_v26 = vld [vmem:[#allocation0 + $0x290] sm:$0xff]  ;;  %3482 = vst [vmem:[%s4514_s1 + $0xc0] sm:$0xff] %v3302_v8   ;;  %v3347_v29 = vpack.c.bf16 %v2591_v21, %v2584_v5  ;;  %v3352_v30 = vpack.c.bf16 %v2605_v22, %v2598_v6 }
 0x15f   :  { %3483 = vst [vmem:[%s4514_s1 + $0xc8] sm:$0xff] %v3307_v9   ;;  %3484 = vst [vmem:[%s4514_s1 + $0xd0] sm:$0xff] %v3312_v10   ;;  %v3357_v31 = vpack.c.bf16 %v2619_v23, %v2612_v7  ;;  %v2633_v32 = vld [vmem:[#allocation0 + $0x248] sm:$0xff]  ;;  %v2647_v33 = vld [vmem:[#allocation0 + $0x258] sm:$0xff] }
 0x160   :  { %v2661_v34 = vld [vmem:[#allocation0 + $0x268] sm:$0xff]  ;;  %v2710_v35 = vld [vmem:[#allocation0 + $0x2a0] sm:$0xff]  ;;  %v2724_v36 = vld [vmem:[#allocation0 + $0x2b0] sm:$0xff]  ;;  %3485 = vst [vmem:[%s4514_s1 + $0xd8] sm:$0xff] %v3317_v17   ;;  %v3362_v38 = vpack.c.bf16 %v2633_v32, %v2626_v14  ;;  %v3367_v39 = vpack.c.bf16 %v2647_v33, %v2640_v15 }
 0x161   :  { %v2738_v37 = vld [vmem:[#allocation0 + $0x2c0] sm:$0xff]  ;;  %3486 = vst [vmem:[%s4514_s1 + $0xe0] sm:$0xff] %v3322_v18   ;;  %3487 = vst [vmem:[%s4514_s1 + $0xe8] sm:$0xff] %v3327_v19   ;;  %v3372_v40 = vpack.c.bf16 %v2661_v34, %v2654_v16  ;;  %v2675_v41 = vld [vmem:[#allocation0 + $0x278] sm:$0xff] }
 0x162   :  { %3490 = vst [vmem:[%s4514_s1 + $0x100] sm:$0xff] %v3342_v20   ;;  %v2689_v42 = vld [vmem:[#allocation0 + $0x288] sm:$0xff]  ;;  %v2703_v43 = vld [vmem:[#allocation0 + $0x298] sm:$0xff]  ;;  %v2752_v44 = vld [vmem:[#allocation0 + $0x2d0] sm:$0xff]  ;;  %v3377_v47 = vpack.c.bf16 %v2675_v41, %v2668_v24 }
 0x163   :  { %v2766_v45 = vld [vmem:[#allocation0 + $0x2e0] sm:$0xff]  ;;  %v2780_v46 = vld [vmem:[#allocation0 + $0x2f0] sm:$0xff]  ;;  %3488 = vst [vmem:[%s4514_s1 + $0xf0] sm:$0xff] %v3332_v27   ;;  %3489 = vst [vmem:[%s4514_s1 + $0xf8] sm:$0xff] %v3337_v28   ;;  %v3382_v48 = vpack.c.bf16 %v2689_v42, %v2682_v25  ;;  %v3387_v49 = vpack.c.bf16 %v2703_v43, %v2696_v26 }
 0x164   :  { %3491 = vst [vmem:[%s4514_s1 + $0x108] sm:$0xff] %v3347_v29   ;;  %3492 = vst [vmem:[%s4514_s1 + $0x110] sm:$0xff] %v3352_v30   ;;  %v2717_v50 = vld [vmem:[#allocation0 + $0x2a8] sm:$0xff]  ;;  %v2731_v51 = vld [vmem:[#allocation0 + $0x2b8] sm:$0xff] }
 0x165   :  { %3493 = vst [vmem:[%s4514_s1 + $0x118] sm:$0xff] %v3357_v31   ;;  %v2745_v52 = vld [vmem:[#allocation0 + $0x2c8] sm:$0xff]  ;;  %v2794_v53 = vld [vmem:[#allocation0 + $0x300] sm:$0xff]  ;;  %v2808_v54 = vld [vmem:[#allocation0 + $0x310] sm:$0xff]  ;;  %v3392_v56 = vpack.c.bf16 %v2717_v50, %v2710_v35  ;;  %v3397_v57 = vpack.c.bf16 %v2731_v51, %v2724_v36 }
 0x166   :  { %v2822_v55 = vld [vmem:[#allocation0 + $0x320] sm:$0xff]  ;;  %3494 = vst [vmem:[%s4514_s1 + $0x120] sm:$0xff] %v3362_v38   ;;  %3495 = vst [vmem:[%s4514_s1 + $0x128] sm:$0xff] %v3367_v39   ;;  %v3402_v58 = vpack.c.bf16 %v2745_v52, %v2738_v37  ;;  %v2759_v59 = vld [vmem:[#allocation0 + $0x2d8] sm:$0xff] }
 0x167   :  { %3496 = vst [vmem:[%s4514_s1 + $0x130] sm:$0xff] %v3372_v40   ;;  %v2773_v60 = vld [vmem:[#allocation0 + $0x2e8] sm:$0xff]  ;;  %v2787_v61 = vld [vmem:[#allocation0 + $0x2f8] sm:$0xff]  ;;  %v2836_v62 = vld [vmem:[#allocation0 + $0x330] sm:$0xff]  ;;  %v3407_v1 = vpack.c.bf16 %v2759_v59, %v2752_v44 }
 0x168   :  { %v2850_v63 = vld [vmem:[#allocation0 + $0x340] sm:$0xff]  ;;  %v2864_v0 = vld [vmem:[#allocation0 + $0x350] sm:$0xff]  ;;  %3497 = vst [vmem:[%s4514_s1 + $0x138] sm:$0xff] %v3377_v47   ;;  %3498 = vst [vmem:[%s4514_s1 + $0x140] sm:$0xff] %v3382_v48   ;;  %v3412_v2 = vpack.c.bf16 %v2773_v60, %v2766_v45  ;;  %v3417_v3 = vpack.c.bf16 %v2787_v61, %v2780_v46 }
 0x169   :  { %3499 = vst [vmem:[%s4514_s1 + $0x148] sm:$0xff] %v3387_v49   ;;  %v2801_v4 = vld [vmem:[#allocation0 + $0x308] sm:$0xff]  ;;  %v2815_v5 = vld [vmem:[#allocation0 + $0x318] sm:$0xff]  ;;  %v2878_v7 = vld [vmem:[#allocation0 + $0x360] sm:$0xff] }
 0x16a   :  { %v2829_v6 = vld [vmem:[#allocation0 + $0x328] sm:$0xff]  ;;  %3500 = vst [vmem:[%s4514_s1 + $0x150] sm:$0xff] %v3392_v56   ;;  %3501 = vst [vmem:[%s4514_s1 + $0x158] sm:$0xff] %v3397_v57   ;;  %v3422_v8 = vpack.c.bf16 %v2801_v4, %v2794_v53  ;;  %v3427_v9 = vpack.c.bf16 %v2815_v5, %v2808_v54  ;;  %v2843_v11 = vld [vmem:[#allocation0 + $0x338] sm:$0xff] }
 0x16b   :  { %3502 = vst [vmem:[%s4514_s1 + $0x160] sm:$0xff] %v3402_v58   ;;  %v3432_v10 = vpack.c.bf16 %v2829_v6, %v2822_v55  ;;  %v2857_v12 = vld [vmem:[#allocation0 + $0x348] sm:$0xff]  ;;  %v2871_v13 = vld [vmem:[#allocation0 + $0x358] sm:$0xff]  ;;  %3503 = vst [vmem:[%s4514_s1 + $0x168] sm:$0xff] %v3407_v1   ;;  %v3437_v14 = vpack.c.bf16 %v2843_v11, %v2836_v62 }
 0x16c   :  { %3504 = vst [vmem:[%s4514_s1 + $0x170] sm:$0xff] %v3412_v2   ;;  %3505 = vst [vmem:[%s4514_s1 + $0x178] sm:$0xff] %v3417_v3   ;;  %v3442_v15 = vpack.c.bf16 %v2857_v12, %v2850_v63  ;;  %v3447_v16 = vpack.c.bf16 %v2871_v13, %v2864_v0  ;;  %v2885_v17 = vld [vmem:[#allocation0 + $0x368] sm:$0xff]  ;;  %v2892_v18 = vld [vmem:[#allocation0 + $0x370] sm:$0xff] }
 0x16d   :  { %v2899_v19 = vld [vmem:[#allocation0 + $0x378] sm:$0xff]  ;;  %3506 = vst [vmem:[%s4514_s1 + $0x180] sm:$0xff] %v3422_v8   ;;  %3507 = vst [vmem:[%s4514_s1 + $0x188] sm:$0xff] %v3427_v9   ;;  %v3452_v20 = vpack.c.bf16 %v2885_v17, %v2878_v7 }
 0x16e   :  { %3508 = vst [vmem:[%s4514_s1 + $0x190] sm:$0xff] %v3432_v10   ;;  %v3457_v21 = vpack.c.bf16 %v2899_v19, %v2892_v18  ;;  %3509 = vst [vmem:[%s4514_s1 + $0x198] sm:$0xff] %v3437_v14  }
 0x16f   :  { %3510 = vst [vmem:[%s4514_s1 + $0x1a0] sm:$0xff] %v3442_v15   ;;  %3511 = vst [vmem:[%s4514_s1 + $0x1a8] sm:$0xff] %v3447_v16  }
 0x170   :  { %3512 = vst [vmem:[%s4514_s1 + $0x1b0] sm:$0xff] %v3452_v20   ;;  %3513 = vst [vmem:[%s4514_s1 + $0x1b8] sm:$0xff] %v3457_v21  }

// kernel: cnn_model_small.1
= control target key start
LH: loop header
LB: loop body
LE: loop exit
PB: predicated region body
PF: predicated region fallthrough
CT: control target
= control target key end

     0   :  { %10 = vsyncpa [#allocation3], 0  ;;  %s2388_s18 = smov [#allocation2]   ;;  %s2544_s0 = inlined_call_operand.vmem [shape: bf16[8,256], index: 0, kind: input, shape index: {}]   ;;  %s2545_s1 = inlined_call_operand.hbm [shape: bf16[256,1536], index: 1, kind: input, shape index: {}]   ;;  %s2546_s2 = inlined_call_operand.vmem [shape: f32[1,384], index: 2, kind: input, shape index: {}]   ;;  %s2547_s3 = inlined_call_operand.vmem [shape: bf16[384,128], index: 3, kind: input, shape index: {}]   ;;  %s2548_s4 = inlined_call_operand.vmem [shape: f32[1,128], index: 4, kind: input, shape index: {}]   ;;  %s2549_s5 = inlined_call_operand.vmem [shape: f32[8,128], index: 5, kind: output, shape index: {}]  }
   0x1   :  { %s18_s19 = sshll.u32 %s2388_s18, 4  ;;  %s2364_s22 = scalar_lea.hbm %s2545_s1, 24576  ;;  %s19_s19 = int_to_ptr.vmem [resolvable:$true] %s18_s19 }
   0x2   :  { %p2365_p0 = scmp.ne.s32.totalorder %s2545_s1, %s2364_s22  ;;  %p2368_p1 = scmp.lt.u32.totalorder %s2364_s22, %s2545_s1 }
   0x4   :  { %p2370_p2 = pnand %p2368_p1, %p2365_p0 }
   0x6   :  { %2373 = shalt.err (!%p2370_p2)
}
   0x7   :  { %s2374_s27 = scalar_lea.vmem %s19_s19, 24576  ;;  %p2379_p4 = scmp.lt.s32.totalorder %s19_s19, %s19_s19 }
   0x8   :  { %p2375_p3 = scmp.ne.s32.totalorder %s19_s19, %s2374_s27  ;;  %p2380_p5 = scmp.lt.s32.totalorder %s2374_s27, %s2374_s27 }
   0xa   :  { %p2381_p6 = por %p2380_p5, %p2379_p4 }
   0xc   :  { %p2382_p7 = pnand %p2381_p6, %p2375_p3 }
   0xe   :  { %2385 = shalt.err (!%p2382_p7)
}
   0xf   :  { %s2389_s28 = smov 768   ;;  %s2390_s29 = smov 48  }
  0x10   :  { %24 = dma.hbm_to_vmem [thread:$0]  %s2545_s1, 24576, %s19_s19, [#allocation3], %s2389_s28, %s2389_s28, %s2390_s29  }
  0x11   :  { %2386 = dma.done.wait [#allocation3], 24576  }
  0x12   :  { %2387 = vsyncadd [#allocation3], 4294942720  ;;  %v2046_v0 = vld [vmem:[#allocation2 + $0x4] ss:$48 sps:$4 sm:$0xff]   ;;  %v2048_v1 = vld [vmem:[#allocation2 + $0xc] ss:$48 sps:$4 sm:$0xff]  }
  0x13   :  { %1195 = vmatprep.subr.bf16.mxu0 %v2046_v0  ;;  %v2050_v2 = vld [vmem:[#allocation2] ss:$48 sps:$4 sm:$0xff]   ;;  %v2051_v3 = vld [vmem:[#allocation2 + $0x8] ss:$48 sps:$4 sm:$0xff]   ;;  %1236 = vmatprep.subr.bf16.mxu1 %v2048_v1  ;;  %v2052_v4 = vld [vmem:[#allocation2 + $0x64] ss:$48 sps:$4 sm:$0xff]  }
  0x14   :  { %1196 = vmatpush1.bf16.msra.mxu0 %v2050_v2  ;;  %1237 = vmatpush1.bf16.msra.mxu1 %v2051_v3  ;;  %v2054_v5 = vld [vmem:[#allocation2 + $0x6c] ss:$48 sps:$4 sm:$0xff]   ;;  %v2056_v6 = vld [vmem:[#allocation2 + $0x60] ss:$48 sps:$4 sm:$0xff]   ;;  %v2057_v7 = vld [vmem:[#allocation2 + $0x68] ss:$48 sps:$4 sm:$0xff]  }
  0x15   :  { %1197 = vmatprep.subr.bf16.mxu0 %v2052_v4  ;;  %1238 = vmatprep.subr.bf16.mxu1 %v2054_v5  ;;  %v2058_v8 = vld [vmem:[#allocation2 + $0xc4] ss:$48 sps:$4 sm:$0xff]   ;;  %v2060_v9 = vld [vmem:[#allocation2 + $0xcc] ss:$48 sps:$4 sm:$0xff]   ;;  %v2062_v10 = vld [vmem:[#allocation2 + $0xc0] ss:$48 sps:$4 sm:$0xff]  }
  0x16   :  { %v2063_v11 = vld [vmem:[#allocation2 + $0xc8] ss:$48 sps:$4 sm:$0xff]   ;;  %v2064_v12 = vld [vmem:[#allocation2 + $0x124] ss:$48 sps:$4 sm:$0xff]   ;;  %v2066_v13 = vld [vmem:[#allocation2 + $0x12c] ss:$48 sps:$4 sm:$0xff]  }
  0x17   :  { %v2068_v14 = vld [vmem:[#allocation2 + $0x120] ss:$48 sps:$4 sm:$0xff]   ;;  %v2069_v15 = vld [vmem:[#allocation2 + $0x128] ss:$48 sps:$4 sm:$0xff]   ;;  %v2070_v16 = vld [vmem:[#allocation2 + $0x184] ss:$48 sps:$4 sm:$0xff]  }
  0x18   :  { %1198 = vmatpush1.bf16.msra.mxu0 %v2056_v6  ;;  %1239 = vmatpush1.bf16.msra.mxu1 %v2057_v7  ;;  %v2072_v17 = vld [vmem:[#allocation2 + $0x18c] ss:$48 sps:$4 sm:$0xff]   ;;  %v2074_v18 = vld [vmem:[#allocation2 + $0x180] ss:$48 sps:$4 sm:$0xff]   ;;  %v2075_v19 = vld [vmem:[#allocation2 + $0x188] ss:$48 sps:$4 sm:$0xff]  }
  0x19   :  { %1199 = vmatprep.subr.bf16.mxu0 %v2058_v8  ;;  %1240 = vmatprep.subr.bf16.mxu1 %v2060_v9  ;;  %v2076_v20 = vld [vmem:[#allocation2 + $0x1e4] ss:$48 sps:$4 sm:$0xff]   ;;  %v2078_v21 = vld [vmem:[#allocation2 + $0x1ec] ss:$48 sps:$4 sm:$0xff]   ;;  %v2080_v22 = vld [vmem:[#allocation2 + $0x1e0] ss:$48 sps:$4 sm:$0xff]  }
  0x1a   :  { %v2081_v23 = vld [vmem:[#allocation2 + $0x1e8] ss:$48 sps:$4 sm:$0xff]   ;;  %v2082_v24 = vld [vmem:[#allocation2 + $0x244] ss:$48 sps:$4 sm:$0xff]   ;;  %v2084_v25 = vld [vmem:[#allocation2 + $0x24c] ss:$48 sps:$4 sm:$0xff]  }
  0x1b   :  { %v2086_v26 = vld [vmem:[#allocation2 + $0x240] ss:$48 sps:$4 sm:$0xff]   ;;  %v2087_v27 = vld [vmem:[#allocation2 + $0x248] ss:$48 sps:$4 sm:$0xff]   ;;  %v2088_v28 = vld [vmem:[#allocation2 + $0x2a4] ss:$48 sps:$4 sm:$0xff]  }
  0x1c   :  { %1200 = vmatpush1.bf16.msra.mxu0 %v2062_v10  ;;  %1241 = vmatpush1.bf16.msra.mxu1 %v2063_v11  ;;  %v2090_v29 = vld [vmem:[#allocation2 + $0x2ac] ss:$48 sps:$4 sm:$0xff]   ;;  %v2092_v30 = vld [vmem:[#allocation2 + $0x2a0] ss:$48 sps:$4 sm:$0xff]   ;;  %v2093_v31 = vld [vmem:[#allocation2 + $0x2a8] ss:$48 sps:$4 sm:$0xff]  }
  0x1d   :  { %1201 = vmatprep.subr.bf16.mxu0 %v2064_v12  ;;  %1242 = vmatprep.subr.bf16.mxu1 %v2066_v13  ;;  %v2094_v32 = vld [vmem:[#allocation2 + $0x304] ss:$48 sps:$4 sm:$0xff]   ;;  %v2096_v33 = vld [vmem:[#allocation2 + $0x30c] ss:$48 sps:$4 sm:$0xff]   ;;  %v2098_v34 = vld [vmem:[#allocation2 + $0x300] ss:$48 sps:$4 sm:$0xff]  }
  0x1e   :  { %v2099_v35 = vld [vmem:[#allocation2 + $0x308] ss:$48 sps:$4 sm:$0xff]   ;;  %v2100_v36 = vld [vmem:[#allocation2 + $0x364] ss:$48 sps:$4 sm:$0xff]   ;;  %v2102_v37 = vld [vmem:[#allocation2 + $0x36c] ss:$48 sps:$4 sm:$0xff]  }
  0x1f   :  { %v2104_v38 = vld [vmem:[#allocation2 + $0x360] ss:$48 sps:$4 sm:$0xff]   ;;  %v2105_v39 = vld [vmem:[#allocation2 + $0x368] ss:$48 sps:$4 sm:$0xff]   ;;  %v2106_v40 = vld [vmem:[#allocation2 + $0x3c4] ss:$48 sps:$4 sm:$0xff]  }
  0x20   :  { %1202 = vmatpush1.bf16.msra.mxu0 %v2068_v14  ;;  %1243 = vmatpush1.bf16.msra.mxu1 %v2069_v15  ;;  %v2108_v41 = vld [vmem:[#allocation2 + $0x3cc] ss:$48 sps:$4 sm:$0xff]   ;;  %v2110_v42 = vld [vmem:[#allocation2 + $0x3c0] ss:$48 sps:$4 sm:$0xff]   ;;  %v2111_v43 = vld [vmem:[#allocation2 + $0x3c8] ss:$48 sps:$4 sm:$0xff]  }
  0x21   :  { %1203 = vmatprep.subr.bf16.mxu0 %v2070_v16  ;;  %1244 = vmatprep.subr.bf16.mxu1 %v2072_v17  ;;  %v2112_v44 = vld [vmem:[#allocation2 + $0x424] ss:$48 sps:$4 sm:$0xff]   ;;  %v2114_v45 = vld [vmem:[#allocation2 + $0x42c] ss:$48 sps:$4 sm:$0xff]   ;;  %v2116_v47 = vld [vmem:[#allocation2 + $0x420] ss:$48 sps:$4 sm:$0xff]  }
  0x22   :  { %v35_v46 = vld [vmem:[%s2544_s0] sm:$0xff]  ;;  %v2117_v49 = vld [vmem:[#allocation2 + $0x428] ss:$48 sps:$4 sm:$0xff]   ;;  %v2120_v51 = vld [vmem:[#allocation2 + $0x48c] ss:$48 sps:$4 sm:$0xff]   ;;  %vm2392_vm0 = vmmov 0  }
  0x23   :  { %v2438_v48 = vcombine.high %v35_v46, %v35_v46  ;;  %v2118_v50 = vld [vmem:[#allocation2 + $0x484] ss:$48 sps:$4 sm:$0xff]   ;;  %v2122_v52 = vld [vmem:[#allocation2 + $0x480] ss:$48 sps:$4 sm:$0xff]   ;;  %v2123_v53 = vld [vmem:[#allocation2 + $0x488] ss:$48 sps:$4 sm:$0xff]   ;;  %v2442_v4 = vcombine.low %v35_v46, %v35_v46 }
  0x24   :  { %1204 = vmatpush1.bf16.msra.mxu0 %v2074_v18  ;;  %1245 = vmatpush1.bf16.msra.mxu1 %v2075_v19  ;;  %v2124_v54 = vld [vmem:[#allocation2 + $0x4e4] ss:$48 sps:$4 sm:$0xff]   ;;  %v2126_v55 = vld [vmem:[#allocation2 + $0x4ec] ss:$48 sps:$4 sm:$0xff]   ;;  %v2128_v56 = vld [vmem:[#allocation2 + $0x4e0] ss:$48 sps:$4 sm:$0xff]  }
  0x25   :  { %1205 = vmatprep.subr.bf16.mxu0 %v2076_v20  ;;  %1246 = vmatprep.subr.bf16.mxu1 %v2078_v21  ;;  %v2129_v57 = vld [vmem:[#allocation2 + $0x4e8] ss:$48 sps:$4 sm:$0xff]   ;;  %v2130_v58 = vld [vmem:[#allocation2 + $0x544] ss:$48 sps:$4 sm:$0xff]   ;;  %v2132_v59 = vld [vmem:[#allocation2 + $0x54c] ss:$48 sps:$4 sm:$0xff]  }
  0x26   :  { %1227 = vmatprep.mubr.bf16.mxu0 %v2438_v48  ;;  %1268 = vmatprep.mubr.bf16.mxu1 %v2438_v48  ;;  %v2134_v60 = vld [vmem:[#allocation2 + $0x540] ss:$48 sps:$4 sm:$0xff]   ;;  %v2135_v61 = vld [vmem:[#allocation2 + $0x548] ss:$48 sps:$4 sm:$0xff]   ;;  %v2136_v62 = vld [vmem:[#allocation2 + $0x5a4] ss:$48 sps:$4 sm:$0xff]  }
  0x27   :  { %v2138_v63 = vld [vmem:[#allocation2 + $0x5ac] ss:$48 sps:$4 sm:$0xff]   ;;  %v2140_v0 = vld [vmem:[#allocation2 + $0x5a0] ss:$48 sps:$4 sm:$0xff]   ;;  %v2141_v1 = vld [vmem:[#allocation2 + $0x5a8] ss:$48 sps:$4 sm:$0xff]  }
  0x28   :  { %1206 = vmatpush1.bf16.msra.mxu0 %v2080_v22  ;;  %1247 = vmatpush1.bf16.msra.mxu1 %v2081_v23  ;;  %v2146_v2 = vld [vmem:[#allocation2 + $0x14] ss:$48 sps:$4 sm:$0xff]   ;;  %v2149_v3 = vld [vmem:[#allocation2 + $0x1c] ss:$48 sps:$4 sm:$0xff]   ;;  %v2144_v5 = vld [vmem:[#allocation2 + $0x10] ss:$48 sps:$4 sm:$0xff]  }
  0x29   :  { %1207 = vmatprep.subr.bf16.mxu0 %v2082_v24  ;;  %1248 = vmatprep.subr.bf16.mxu1 %v2084_v25  ;;  %v2147_v6 = vld [vmem:[#allocation2 + $0x18] ss:$48 sps:$4 sm:$0xff]   ;;  %v2152_v7 = vld [vmem:[#allocation2 + $0x74] ss:$48 sps:$4 sm:$0xff]   ;;  %v2155_v8 = vld [vmem:[#allocation2 + $0x7c] ss:$48 sps:$4 sm:$0xff]  }
  0x2a   :  { %v2150_v9 = vld [vmem:[#allocation2 + $0x70] ss:$48 sps:$4 sm:$0xff]   ;;  %v2153_v10 = vld [vmem:[#allocation2 + $0x78] ss:$48 sps:$4 sm:$0xff]   ;;  %v2158_v11 = vld [vmem:[#allocation2 + $0xd4] ss:$48 sps:$4 sm:$0xff]  }
  0x2b   :  { %v2161_v12 = vld [vmem:[#allocation2 + $0xdc] ss:$48 sps:$4 sm:$0xff]   ;;  %v2156_v13 = vld [vmem:[#allocation2 + $0xd0] ss:$48 sps:$4 sm:$0xff]   ;;  %v2159_v14 = vld [vmem:[#allocation2 + $0xd8] ss:$48 sps:$4 sm:$0xff]  }
  0x2c   :  { %1208 = vmatpush1.bf16.msra.mxu0 %v2086_v26  ;;  %1249 = vmatpush1.bf16.msra.mxu1 %v2087_v27  ;;  %v2164_v15 = vld [vmem:[#allocation2 + $0x134] ss:$48 sps:$4 sm:$0xff]   ;;  %v2167_v16 = vld [vmem:[#allocation2 + $0x13c] ss:$48 sps:$4 sm:$0xff]   ;;  %v2162_v17 = vld [vmem:[#allocation2 + $0x130] ss:$48 sps:$4 sm:$0xff]  }
  0x2d   :  { %1209 = vmatprep.subr.bf16.mxu0 %v2088_v28  ;;  %1250 = vmatprep.subr.bf16.mxu1 %v2090_v29  ;;  %v2165_v18 = vld [vmem:[#allocation2 + $0x138] ss:$48 sps:$4 sm:$0xff]   ;;  %v2170_v19 = vld [vmem:[#allocation2 + $0x194] ss:$48 sps:$4 sm:$0xff]   ;;  %v2173_v20 = vld [vmem:[#allocation2 + $0x19c] ss:$48 sps:$4 sm:$0xff]  }
  0x2e   :  { %v2168_v21 = vld [vmem:[#allocation2 + $0x190] ss:$48 sps:$4 sm:$0xff]   ;;  %v2171_v22 = vld [vmem:[#allocation2 + $0x198] ss:$48 sps:$4 sm:$0xff]   ;;  %v2176_v23 = vld [vmem:[#allocation2 + $0x1f4] ss:$48 sps:$4 sm:$0xff]  }
  0x2f   :  { %v2179_v24 = vld [vmem:[#allocation2 + $0x1fc] ss:$48 sps:$4 sm:$0xff]   ;;  %v2174_v25 = vld [vmem:[#allocation2 + $0x1f0] ss:$48 sps:$4 sm:$0xff]   ;;  %v2177_v26 = vld [vmem:[#allocation2 + $0x1f8] ss:$48 sps:$4 sm:$0xff]  }
  0x30   :  { %1210 = vmatpush1.bf16.msra.mxu0 %v2092_v30  ;;  %1251 = vmatpush1.bf16.msra.mxu1 %v2093_v31  ;;  %v2182_v27 = vld [vmem:[#allocation2 + $0x254] ss:$48 sps:$4 sm:$0xff]   ;;  %v2185_v28 = vld [vmem:[#allocation2 + $0x25c] ss:$48 sps:$4 sm:$0xff]   ;;  %v2180_v29 = vld [vmem:[#allocation2 + $0x250] ss:$48 sps:$4 sm:$0xff]  }
  0x31   :  { %1211 = vmatprep.subr.bf16.mxu0 %v2094_v32  ;;  %1252 = vmatprep.subr.bf16.mxu1 %v2096_v33  ;;  %v2183_v30 = vld [vmem:[#allocation2 + $0x258] ss:$48 sps:$4 sm:$0xff]   ;;  %v2188_v31 = vld [vmem:[#allocation2 + $0x2b4] ss:$48 sps:$4 sm:$0xff]   ;;  %v2191_v32 = vld [vmem:[#allocation2 + $0x2bc] ss:$48 sps:$4 sm:$0xff]  }
  0x32   :  { %v2186_v33 = vld [vmem:[#allocation2 + $0x2b0] ss:$48 sps:$4 sm:$0xff]   ;;  %v2207_v46 = vld [vmem:[#allocation2 + $0x3d8] ss:$48 sps:$4 sm:$0xff]  }
  0x34   :  { %1212 = vmatpush1.bf16.msra.mxu0 %v2098_v34  ;;  %1253 = vmatpush1.bf16.msra.mxu1 %v2099_v35  ;;  %v2189_v34 = vld [vmem:[#allocation2 + $0x2b8] ss:$48 sps:$4 sm:$0xff]   ;;  %v2194_v35 = vld [vmem:[#allocation2 + $0x314] ss:$48 sps:$4 sm:$0xff]  }
  0x35   :  { %1213 = vmatprep.subr.bf16.mxu0 %v2100_v36  ;;  %1254 = vmatprep.subr.bf16.mxu1 %v2102_v37  ;;  %v2197_v36 = vld [vmem:[#allocation2 + $0x31c] ss:$48 sps:$4 sm:$0xff]   ;;  %v2192_v37 = vld [vmem:[#allocation2 + $0x310] ss:$48 sps:$4 sm:$0xff]  }
  0x38   :  { %1214 = vmatpush1.bf16.msra.mxu0 %v2104_v38  ;;  %1255 = vmatpush1.bf16.msra.mxu1 %v2105_v39  ;;  %v2195_v38 = vld [vmem:[#allocation2 + $0x318] ss:$48 sps:$4 sm:$0xff]   ;;  %v2200_v39 = vld [vmem:[#allocation2 + $0x374] ss:$48 sps:$4 sm:$0xff]  }
  0x39   :  { %1215 = vmatprep.subr.bf16.mxu0 %v2106_v40  ;;  %1256 = vmatprep.subr.bf16.mxu1 %v2108_v41  ;;  %v2203_v40 = vld [vmem:[#allocation2 + $0x37c] ss:$48 sps:$4 sm:$0xff]   ;;  %v2198_v41 = vld [vmem:[#allocation2 + $0x370] ss:$48 sps:$4 sm:$0xff]  }
  0x3c   :  { %1216 = vmatpush1.bf16.msra.mxu0 %v2110_v42  ;;  %1257 = vmatpush1.bf16.msra.mxu1 %v2111_v43  ;;  %v2201_v42 = vld [vmem:[#allocation2 + $0x378] ss:$48 sps:$4 sm:$0xff]   ;;  %v2206_v43 = vld [vmem:[#allocation2 + $0x3d4] ss:$48 sps:$4 sm:$0xff]  }
  0x3d   :  { %1217 = vmatprep.subr.bf16.mxu0 %v2112_v44  ;;  %1258 = vmatprep.subr.bf16.mxu1 %v2114_v45  ;;  %v2209_v44 = vld [vmem:[#allocation2 + $0x3dc] ss:$48 sps:$4 sm:$0xff]   ;;  %v2204_v45 = vld [vmem:[#allocation2 + $0x3d0] ss:$48 sps:$4 sm:$0xff]  }
  0x40   :  { %1218 = vmatpush1.bf16.msra.mxu0 %v2116_v47  ;;  %1259 = vmatpush1.bf16.msra.mxu1 %v2117_v49  ;;  %v2212_v47 = vld [vmem:[#allocation2 + $0x434] ss:$48 sps:$4 sm:$0xff]   ;;  %v2215_v49 = vld [vmem:[#allocation2 + $0x43c] ss:$48 sps:$4 sm:$0xff]  }
  0x41   :  { %1219 = vmatprep.subr.bf16.mxu0 %v2118_v50  ;;  %1260 = vmatprep.subr.bf16.mxu1 %v2120_v51  ;;  %v2210_v50 = vld [vmem:[#allocation2 + $0x430] ss:$48 sps:$4 sm:$0xff]   ;;  %v2213_v51 = vld [vmem:[#allocation2 + $0x438] ss:$48 sps:$4 sm:$0xff]  }
  0x44   :  { %1220 = vmatpush1.bf16.msra.mxu0 %v2122_v52  ;;  %1261 = vmatpush1.bf16.msra.mxu1 %v2123_v53  ;;  %v2218_v52 = vld [vmem:[#allocation2 + $0x494] ss:$48 sps:$4 sm:$0xff]   ;;  %v2221_v53 = vld [vmem:[#allocation2 + $0x49c] ss:$48 sps:$4 sm:$0xff]  }
  0x45   :  { %1221 = vmatprep.subr.bf16.mxu0 %v2124_v54  ;;  %1262 = vmatprep.subr.bf16.mxu1 %v2126_v55  ;;  %v2216_v54 = vld [vmem:[#allocation2 + $0x490] ss:$48 sps:$4 sm:$0xff]   ;;  %v2219_v55 = vld [vmem:[#allocation2 + $0x498] ss:$48 sps:$4 sm:$0xff]  }
  0x48   :  { %1222 = vmatpush1.bf16.msra.mxu0 %v2128_v56  ;;  %1263 = vmatpush1.bf16.msra.mxu1 %v2129_v57  ;;  %v2224_v56 = vld [vmem:[#allocation2 + $0x4f4] ss:$48 sps:$4 sm:$0xff]   ;;  %v2227_v57 = vld [vmem:[#allocation2 + $0x4fc] ss:$48 sps:$4 sm:$0xff]  }
  0x49   :  { %1223 = vmatprep.subr.bf16.mxu0 %v2130_v58  ;;  %1264 = vmatprep.subr.bf16.mxu1 %v2132_v59  ;;  %v2222_v58 = vld [vmem:[#allocation2 + $0x4f0] ss:$48 sps:$4 sm:$0xff]   ;;  %v2225_v59 = vld [vmem:[#allocation2 + $0x4f8] ss:$48 sps:$4 sm:$0xff]  }
  0x4c   :  { %1224 = vmatpush1.bf16.msra.mxu0 %v2134_v60  ;;  %1265 = vmatpush1.bf16.msra.mxu1 %v2135_v61  ;;  %v2230_v60 = vld [vmem:[#allocation2 + $0x554] ss:$48 sps:$4 sm:$0xff]   ;;  %v2233_v61 = vld [vmem:[#allocation2 + $0x55c] ss:$48 sps:$4 sm:$0xff]  }
  0x4d   :  { %1225 = vmatprep.subr.bf16.mxu0 %v2136_v62  ;;  %1266 = vmatprep.subr.bf16.mxu1 %v2138_v63  ;;  %v2228_v62 = vld [vmem:[#allocation2 + $0x550] ss:$48 sps:$4 sm:$0xff]   ;;  %v2231_v63 = vld [vmem:[#allocation2 + $0x558] ss:$48 sps:$4 sm:$0xff]  }
  0x50   :  { %1226 = vmatpush1.bf16.msra.mxu0 %v2140_v0  ;;  %1267 = vmatpush1.bf16.msra.mxu1 %v2141_v1  ;;  %v2236_v0 = vld [vmem:[#allocation2 + $0x5b4] ss:$48 sps:$4 sm:$0xff]   ;;  %v2239_v1 = vld [vmem:[#allocation2 + $0x5bc] ss:$48 sps:$4 sm:$0xff]  }
  0x51   :  { %1277 = vmatprep.subr.bf16.mxu0 %v2146_v2  ;;  %1318 = vmatprep.subr.bf16.mxu1 %v2149_v3  ;;  %v2234_v2 = vld [vmem:[#allocation2 + $0x5b0] ss:$48 sps:$4 sm:$0xff]   ;;  %v2237_v3 = vld [vmem:[#allocation2 + $0x5b8] ss:$48 sps:$4 sm:$0xff]  }
  0x53   :  { %1228 = vmatmul.mubr.bf16.vlgmr.msra.gmra.mrb[0].mxu0 %v2442_v4  ;;  %1269 = vmatmul.mubr.bf16.vlgmr.msra.gmra.mrb[0].mxu1 %v2442_v4 }
  0x54   :  { %1278 = vmatpush1.bf16.msra.mxu0 %v2144_v5  ;;  %1319 = vmatpush1.bf16.msra.mxu1 %v2147_v6  ;;  %v2242_v5 = vld [vmem:[#allocation2 + $0x24] ss:$48 sps:$4 sm:$0xff]   ;;  %v2245_v6 = vld [vmem:[#allocation2 + $0x2c] ss:$48 sps:$4 sm:$0xff]  }
  0x55   :  { %1279 = vmatprep.subr.bf16.mxu0 %v2152_v7  ;;  %1320 = vmatprep.subr.bf16.mxu1 %v2155_v8  ;;  %v2240_v7 = vld [vmem:[#allocation2 + $0x20] ss:$48 sps:$4 sm:$0xff]   ;;  %v2243_v8 = vld [vmem:[#allocation2 + $0x28] ss:$48 sps:$4 sm:$0xff]  }
  0x56   :  { %1309 = vmatprep.mubr.bf16.mxu0 %v2438_v48  ;;  %1350 = vmatprep.mubr.bf16.mxu1 %v2438_v48 }
  0x58   :  { %1280 = vmatpush1.bf16.msra.mxu0 %v2150_v9  ;;  %1321 = vmatpush1.bf16.msra.mxu1 %v2153_v10  ;;  %v2248_v9 = vld [vmem:[#allocation2 + $0x84] ss:$48 sps:$4 sm:$0xff]   ;;  %v2251_v10 = vld [vmem:[#allocation2 + $0x8c] ss:$48 sps:$4 sm:$0xff]  }
  0x59   :  { %1281 = vmatprep.subr.bf16.mxu0 %v2158_v11  ;;  %1322 = vmatprep.subr.bf16.mxu1 %v2161_v12  ;;  %v2246_v11 = vld [vmem:[#allocation2 + $0x80] ss:$48 sps:$4 sm:$0xff]   ;;  %v2249_v12 = vld [vmem:[#allocation2 + $0x88] ss:$48 sps:$4 sm:$0xff]  }
  0x5c   :  { %1282 = vmatpush1.bf16.msra.mxu0 %v2156_v13  ;;  %1323 = vmatpush1.bf16.msra.mxu1 %v2159_v14  ;;  %v2254_v13 = vld [vmem:[#allocation2 + $0xe4] ss:$48 sps:$4 sm:$0xff]   ;;  %v2257_v14 = vld [vmem:[#allocation2 + $0xec] ss:$48 sps:$4 sm:$0xff]  }
  0x5d   :  { %1283 = vmatprep.subr.bf16.mxu0 %v2164_v15  ;;  %1324 = vmatprep.subr.bf16.mxu1 %v2167_v16  ;;  %v2252_v15 = vld [vmem:[#allocation2 + $0xe0] ss:$48 sps:$4 sm:$0xff]   ;;  %v2255_v16 = vld [vmem:[#allocation2 + $0xe8] ss:$48 sps:$4 sm:$0xff]  }
  0x60   :  { %1284 = vmatpush1.bf16.msra.mxu0 %v2162_v17  ;;  %1325 = vmatpush1.bf16.msra.mxu1 %v2165_v18  ;;  %v2260_v17 = vld [vmem:[#allocation2 + $0x144] ss:$48 sps:$4 sm:$0xff]   ;;  %v2263_v18 = vld [vmem:[#allocation2 + $0x14c] ss:$48 sps:$4 sm:$0xff]  }
  0x61   :  { %1285 = vmatprep.subr.bf16.mxu0 %v2170_v19  ;;  %1326 = vmatprep.subr.bf16.mxu1 %v2173_v20  ;;  %v2258_v19 = vld [vmem:[#allocation2 + $0x140] ss:$48 sps:$4 sm:$0xff]   ;;  %v2261_v20 = vld [vmem:[#allocation2 + $0x148] ss:$48 sps:$4 sm:$0xff]  }
  0x64   :  { %1286 = vmatpush1.bf16.msra.mxu0 %v2168_v21  ;;  %1327 = vmatpush1.bf16.msra.mxu1 %v2171_v22  ;;  %v2266_v21 = vld [vmem:[#allocation2 + $0x1a4] ss:$48 sps:$4 sm:$0xff]   ;;  %v2269_v22 = vld [vmem:[#allocation2 + $0x1ac] ss:$48 sps:$4 sm:$0xff]  }
  0x65   :  { %1287 = vmatprep.subr.bf16.mxu0 %v2176_v23  ;;  %1328 = vmatprep.subr.bf16.mxu1 %v2179_v24  ;;  %v2264_v23 = vld [vmem:[#allocation2 + $0x1a0] ss:$48 sps:$4 sm:$0xff]   ;;  %v2267_v24 = vld [vmem:[#allocation2 + $0x1a8] ss:$48 sps:$4 sm:$0xff]  }
  0x68   :  { %1288 = vmatpush1.bf16.msra.mxu0 %v2174_v25  ;;  %1329 = vmatpush1.bf16.msra.mxu1 %v2177_v26  ;;  %v2275_v25 = vld [vmem:[#allocation2 + $0x20c] ss:$48 sps:$4 sm:$0xff]   ;;  %v2270_v26 = vld [vmem:[#allocation2 + $0x200] ss:$48 sps:$4 sm:$0xff]  }
  0x69   :  { %1289 = vmatprep.subr.bf16.mxu0 %v2182_v27  ;;  %1330 = vmatprep.subr.bf16.mxu1 %v2185_v28  ;;  %v2273_v27 = vld [vmem:[#allocation2 + $0x208] ss:$48 sps:$4 sm:$0xff]   ;;  %v2278_v28 = vld [vmem:[#allocation2 + $0x264] ss:$48 sps:$4 sm:$0xff]  }
  0x6c   :  { %1290 = vmatpush1.bf16.msra.mxu0 %v2180_v29  ;;  %1331 = vmatpush1.bf16.msra.mxu1 %v2183_v30  ;;  %v2281_v29 = vld [vmem:[#allocation2 + $0x26c] ss:$48 sps:$4 sm:$0xff]   ;;  %v2276_v30 = vld [vmem:[#allocation2 + $0x260] ss:$48 sps:$4 sm:$0xff]  }
  0x6d   :  { %1291 = vmatprep.subr.bf16.mxu0 %v2188_v31  ;;  %1332 = vmatprep.subr.bf16.mxu1 %v2191_v32  ;;  %v2279_v31 = vld [vmem:[#allocation2 + $0x268] ss:$48 sps:$4 sm:$0xff]   ;;  %v2284_v32 = vld [vmem:[#allocation2 + $0x2c4] ss:$48 sps:$4 sm:$0xff]  }
  0x70   :  { %1292 = vmatpush1.bf16.msra.mxu0 %v2186_v33  ;;  %1333 = vmatpush1.bf16.msra.mxu1 %v2189_v34  ;;  %v2287_v33 = vld [vmem:[#allocation2 + $0x2cc] ss:$48 sps:$4 sm:$0xff]   ;;  %v2282_v34 = vld [vmem:[#allocation2 + $0x2c0] ss:$48 sps:$4 sm:$0xff]  }
  0x71   :  { %1293 = vmatprep.subr.bf16.mxu0 %v2194_v35  ;;  %1334 = vmatprep.subr.bf16.mxu1 %v2197_v36  ;;  %v2285_v35 = vld [vmem:[#allocation2 + $0x2c8] ss:$48 sps:$4 sm:$0xff]   ;;  %v2290_v36 = vld [vmem:[#allocation2 + $0x324] ss:$48 sps:$4 sm:$0xff]  }
  0x74   :  { %1294 = vmatpush1.bf16.msra.mxu0 %v2192_v37  ;;  %1335 = vmatpush1.bf16.msra.mxu1 %v2195_v38  ;;  %v2293_v37 = vld [vmem:[#allocation2 + $0x32c] ss:$48 sps:$4 sm:$0xff]   ;;  %v2288_v38 = vld [vmem:[#allocation2 + $0x320] ss:$48 sps:$4 sm:$0xff]  }
  0x75   :  { %1295 = vmatprep.subr.bf16.mxu0 %v2200_v39  ;;  %1336 = vmatprep.subr.bf16.mxu1 %v2203_v40  ;;  %v2291_v39 = vld [vmem:[#allocation2 + $0x328] ss:$48 sps:$4 sm:$0xff]   ;;  %v2296_v40 = vld [vmem:[#allocation2 + $0x384] ss:$48 sps:$4 sm:$0xff]  }
  0x78   :  { %1296 = vmatpush1.bf16.msra.mxu0 %v2198_v41  ;;  %1337 = vmatpush1.bf16.msra.mxu1 %v2201_v42  ;;  %v2299_v41 = vld [vmem:[#allocation2 + $0x38c] ss:$48 sps:$4 sm:$0xff]   ;;  %v2294_v42 = vld [vmem:[#allocation2 + $0x380] ss:$48 sps:$4 sm:$0xff]  }
  0x79   :  { %1297 = vmatprep.subr.bf16.mxu0 %v2206_v43  ;;  %1338 = vmatprep.subr.bf16.mxu1 %v2209_v44  ;;  %v2297_v43 = vld [vmem:[#allocation2 + $0x388] ss:$48 sps:$4 sm:$0xff]   ;;  %v2302_v44 = vld [vmem:[#allocation2 + $0x3e4] ss:$48 sps:$4 sm:$0xff]  }
  0x7c   :  { %1298 = vmatpush1.bf16.msra.mxu0 %v2204_v45  ;;  %1339 = vmatpush1.bf16.msra.mxu1 %v2207_v46  ;;  %v2305_v45 = vld [vmem:[#allocation2 + $0x3ec] ss:$48 sps:$4 sm:$0xff]   ;;  %v2300_v46 = vld [vmem:[#allocation2 + $0x3e0] ss:$48 sps:$4 sm:$0xff]  }
  0x7d   :  { %1299 = vmatprep.subr.bf16.mxu0 %v2212_v47  ;;  %1340 = vmatprep.subr.bf16.mxu1 %v2215_v49  ;;  %v2303_v47 = vld [vmem:[#allocation2 + $0x3e8] ss:$48 sps:$4 sm:$0xff]   ;;  %v2308_v49 = vld [vmem:[#allocation2 + $0x444] ss:$48 sps:$4 sm:$0xff]  }
  0x80   :  { %1300 = vmatpush1.bf16.msra.mxu0 %v2210_v50  ;;  %1341 = vmatpush1.bf16.msra.mxu1 %v2213_v51  ;;  %v2311_v50 = vld [vmem:[#allocation2 + $0x44c] ss:$48 sps:$4 sm:$0xff]   ;;  %v2306_v51 = vld [vmem:[#allocation2 + $0x440] ss:$48 sps:$4 sm:$0xff]  }
  0x81   :  { %1301 = vmatprep.subr.bf16.mxu0 %v2218_v52  ;;  %1342 = vmatprep.subr.bf16.mxu1 %v2221_v53  ;;  %v2309_v52 = vld [vmem:[#allocation2 + $0x448] ss:$48 sps:$4 sm:$0xff]   ;;  %v2314_v53 = vld [vmem:[#allocation2 + $0x4a4] ss:$48 sps:$4 sm:$0xff]  }
  0x84   :  { %1302 = vmatpush1.bf16.msra.mxu0 %v2216_v54  ;;  %1343 = vmatpush1.bf16.msra.mxu1 %v2219_v55  ;;  %v2317_v54 = vld [vmem:[#allocation2 + $0x4ac] ss:$48 sps:$4 sm:$0xff]   ;;  %v2312_v55 = vld [vmem:[#allocation2 + $0x4a0] ss:$48 sps:$4 sm:$0xff]  }
  0x85   :  { %1303 = vmatprep.subr.bf16.mxu0 %v2224_v56  ;;  %1344 = vmatprep.subr.bf16.mxu1 %v2227_v57  ;;  %v2315_v56 = vld [vmem:[#allocation2 + $0x4a8] ss:$48 sps:$4 sm:$0xff]   ;;  %v2320_v57 = vld [vmem:[#allocation2 + $0x504] ss:$48 sps:$4 sm:$0xff]  }
  0x88   :  { %1304 = vmatpush1.bf16.msra.mxu0 %v2222_v58  ;;  %1345 = vmatpush1.bf16.msra.mxu1 %v2225_v59  ;;  %v2323_v58 = vld [vmem:[#allocation2 + $0x50c] ss:$48 sps:$4 sm:$0xff]   ;;  %v2318_v59 = vld [vmem:[#allocation2 + $0x500] ss:$48 sps:$4 sm:$0xff]  }
  0x89   :  { %1305 = vmatprep.subr.bf16.mxu0 %v2230_v60  ;;  %1346 = vmatprep.subr.bf16.mxu1 %v2233_v61  ;;  %v2321_v60 = vld [vmem:[#allocation2 + $0x508] ss:$48 sps:$4 sm:$0xff]   ;;  %v2326_v61 = vld [vmem:[#allocation2 + $0x564] ss:$48 sps:$4 sm:$0xff]  }
  0x8c   :  { %1306 = vmatpush1.bf16.msra.mxu0 %v2228_v62  ;;  %1347 = vmatpush1.bf16.msra.mxu1 %v2231_v63  ;;  %v2329_v62 = vld [vmem:[#allocation2 + $0x56c] ss:$48 sps:$4 sm:$0xff]   ;;  %v2324_v63 = vld [vmem:[#allocation2 + $0x560] ss:$48 sps:$4 sm:$0xff]  }
  0x8d   :  { %1307 = vmatprep.subr.bf16.mxu0 %v2236_v0  ;;  %1348 = vmatprep.subr.bf16.mxu1 %v2239_v1  ;;  %v2327_v0 = vld [vmem:[#allocation2 + $0x568] ss:$48 sps:$4 sm:$0xff]   ;;  %v2332_v1 = vld [vmem:[#allocation2 + $0x5c4] ss:$48 sps:$4 sm:$0xff]  }
  0x90   :  { %1308 = vmatpush1.bf16.msra.mxu0 %v2234_v2  ;;  %1349 = vmatpush1.bf16.msra.mxu1 %v2237_v3  ;;  %v2335_v2 = vld [vmem:[#allocation2 + $0x5cc] ss:$48 sps:$4 sm:$0xff]   ;;  %v2330_v3 = vld [vmem:[#allocation2 + $0x5c0] ss:$48 sps:$4 sm:$0xff]  }
  0x91   :  { %1359 = vmatprep.subr.bf16.mxu0 %v2242_v5  ;;  %1400 = vmatprep.subr.bf16.mxu1 %v2245_v6  ;;  %v2333_v5 = vld [vmem:[#allocation2 + $0x5c8] ss:$48 sps:$4 sm:$0xff]   ;;  %v2336_v6 = vld [vmem:[%s2547_s3 + $0x40] sm:$0xff]  }
  0x93   :  { %1310 = vmatmul.mubr.bf16.vlgmr.msra.gmra.mrb[4].mxu0 %v2442_v4  ;;  %1351 = vmatmul.mubr.bf16.vlgmr.msra.gmra.mrb[4].mxu1 %v2442_v4 }
  0x94   :  { %1360 = vmatpush1.bf16.msra.mxu0 %v2240_v7  ;;  %1401 = vmatpush1.bf16.msra.mxu1 %v2243_v8  ;;  %v2337_v7 = vld [vmem:[%s2547_s3] sm:$0xff]  }
  0x95   :  { %1361 = vmatprep.subr.bf16.mxu0 %v2248_v9  ;;  %1402 = vmatprep.subr.bf16.mxu1 %v2251_v10  ;;  %v2338_v8 = vld [vmem:[%s2547_s3 + $0x80] sm:$0xff]   ;;  %v2391_v9 = vmov 0.0   ;;  %v2339_v10 = vld [vmem:[%s2547_s3 + $0x48] sm:$0xff]  }
  0x96   :  { %1391 = vmatprep.mubr.bf16.mxu0 %v2438_v48  ;;  %1432 = vmatprep.mubr.bf16.mxu1 %v2438_v48  ;;  %v2272_v48 = vld [vmem:[#allocation2 + $0x204] ss:$48 sps:$4 sm:$0xff]  }
  0x98   :  { %1362 = vmatpush1.bf16.msra.mxu0 %v2246_v11  ;;  %1403 = vmatpush1.bf16.msra.mxu1 %v2249_v12  ;;  %v2340_v11 = vld [vmem:[%s2547_s3 + $0x8] sm:$0xff]   ;;  %v2342_v12 = vld [vmem:[%s2547_s3 + $0x50] sm:$0xff]  }
  0x99   :  { %1363 = vmatprep.subr.bf16.mxu0 %v2254_v13  ;;  %1404 = vmatprep.subr.bf16.mxu1 %v2257_v14  ;;  %v2344_v13 = vld [vmem:[%s2547_s3 + $0x90] sm:$0xff]  }
  0x9a   :  { %v2343_v14 = vld [vmem:[%s2547_s3 + $0x10] sm:$0xff]  }
  0x9c   :  { %1364 = vmatpush1.bf16.msra.mxu0 %v2252_v15  ;;  %1405 = vmatpush1.bf16.msra.mxu1 %v2255_v16  ;;  %v2345_v15 = vld [vmem:[%s2547_s3 + $0x58] sm:$0xff]  }
  0x9d   :  { %1365 = vmatprep.subr.bf16.mxu0 %v2260_v17  ;;  %1406 = vmatprep.subr.bf16.mxu1 %v2263_v18  ;;  %v2347_v16 = vld [vmem:[%s2547_s3 + $0x98] sm:$0xff]   ;;  %v2348_v18 = vld [vmem:[%s2547_s3 + $0x60] sm:$0xff]  }
  0x9e   :  { %v2346_v17 = vld [vmem:[%s2547_s3 + $0x18] sm:$0xff]  }
  0xa0   :  { %1366 = vmatpush1.bf16.msra.mxu0 %v2258_v19  ;;  %1407 = vmatpush1.bf16.msra.mxu1 %v2261_v20  ;;  %v2350_v19 = vld [vmem:[%s2547_s3 + $0xa0] sm:$0xff]  }
  0xa1   :  { %1367 = vmatprep.subr.bf16.mxu0 %v2266_v21  ;;  %1408 = vmatprep.subr.bf16.mxu1 %v2269_v22  ;;  %v2349_v20 = vld [vmem:[%s2547_s3 + $0x20] sm:$0xff]   ;;  %v2351_v21 = vld [vmem:[%s2547_s3 + $0x68] sm:$0xff]  }
  0xa2   :  { %v2352_v22 = vld [vmem:[%s2547_s3 + $0x28] sm:$0xff]  }
  0xa4   :  { %1368 = vmatpush1.bf16.msra.mxu0 %v2264_v23  ;;  %1409 = vmatpush1.bf16.msra.mxu1 %v2267_v24  ;;  %v2353_v23 = vld [vmem:[%s2547_s3 + $0xa8] sm:$0xff]  }
  0xa5   :  { %1369 = vmatprep.subr.bf16.mxu0 %v2272_v48  ;;  %1410 = vmatprep.subr.bf16.mxu1 %v2275_v25 }
  0xa8   :  { %1370 = vmatpush1.bf16.msra.mxu0 %v2270_v26  ;;  %1411 = vmatpush1.bf16.msra.mxu1 %v2273_v27 }
  0xa9   :  { %1371 = vmatprep.subr.bf16.mxu0 %v2278_v28  ;;  %1412 = vmatprep.subr.bf16.mxu1 %v2281_v29 }
  0xac   :  { %1372 = vmatpush1.bf16.msra.mxu0 %v2276_v30  ;;  %1413 = vmatpush1.bf16.msra.mxu1 %v2279_v31 }
  0xad   :  { %1373 = vmatprep.subr.bf16.mxu0 %v2284_v32  ;;  %1414 = vmatprep.subr.bf16.mxu1 %v2287_v33  ;;  %v2354_v32 = vld [vmem:[%s2547_s3 + $0x70] sm:$0xff]  }
  0xae   :  { %v2355_v33 = vld [vmem:[%s2547_s3 + $0x30] sm:$0xff]  }
  0xb0   :  { %1374 = vmatpush1.bf16.msra.mxu0 %v2282_v34  ;;  %1415 = vmatpush1.bf16.msra.mxu1 %v2285_v35  ;;  %v2356_v34 = vld [vmem:[%s2547_s3 + $0xb0] sm:$0xff]   ;;  %v2357_v35 = vld [vmem:[%s2547_s3 + $0x78] sm:$0xff]  }
  0xb1   :  { %1375 = vmatprep.subr.bf16.mxu0 %v2290_v36  ;;  %1416 = vmatprep.subr.bf16.mxu1 %v2293_v37  ;;  %v2358_v36 = vld [vmem:[%s2547_s3 + $0x38] sm:$0xff]  }
  0xb2   :  { %v2359_v37 = vld [vmem:[%s2547_s3 + $0xb8] sm:$0xff]  }
  0xb4   :  { %1376 = vmatpush1.bf16.msra.mxu0 %v2288_v38  ;;  %1417 = vmatpush1.bf16.msra.mxu1 %v2291_v39 }
  0xb5   :  { %1377 = vmatprep.subr.bf16.mxu0 %v2296_v40  ;;  %1418 = vmatprep.subr.bf16.mxu1 %v2299_v41 }
  0xb8   :  { %1378 = vmatpush1.bf16.msra.mxu0 %v2294_v42  ;;  %1419 = vmatpush1.bf16.msra.mxu1 %v2297_v43 }
  0xb9   :  { %1379 = vmatprep.subr.bf16.mxu0 %v2302_v44  ;;  %1420 = vmatprep.subr.bf16.mxu1 %v2305_v45 }
  0xbc   :  { %1380 = vmatpush1.bf16.msra.mxu0 %v2300_v46  ;;  %1421 = vmatpush1.bf16.msra.mxu1 %v2303_v47 }
  0xbd   :  { %1381 = vmatprep.subr.bf16.mxu0 %v2308_v49  ;;  %1422 = vmatprep.subr.bf16.mxu1 %v2311_v50  ;;  %v1452_v49 = vlaneseq }
  0xbf   :  { %v1453_v50 = vshrl.u32 %v1452_v49, 7 }
  0xc0   :  { %1382 = vmatpush1.bf16.msra.mxu0 %v2306_v51  ;;  %1423 = vmatpush1.bf16.msra.mxu1 %v2309_v52  ;;  %v1450_v52 = vld [vmem:[%s2546_s2] sm:$0x7] }
  0xc1   :  { %1383 = vmatprep.subr.bf16.mxu0 %v2314_v53  ;;  %1424 = vmatprep.subr.bf16.mxu1 %v2317_v54  ;;  %v1458_v51 = vsub.s32 1, %v1453_v50  ;;  %v1454_v53 = vsub.s32 0, %v1453_v50  ;;  %v1462_v54 = vsub.s32 2, %v1453_v50 }
  0xc4   :  { %1384 = vmatpush1.bf16.msra.mxu0 %v2312_v55  ;;  %1425 = vmatpush1.bf16.msra.mxu1 %v2315_v56 }
  0xc5   :  { %1385 = vmatprep.subr.bf16.mxu0 %v2320_v57  ;;  %1426 = vmatprep.subr.bf16.mxu1 %v2323_v58  ;;  %v1459_v58 = vrot.slane %v1450_v52, %v1458_v51 }
  0xc8   :  { %1386 = vmatpush1.bf16.msra.mxu0 %v2318_v59  ;;  %1427 = vmatpush1.bf16.msra.mxu1 %v2321_v60 }
  0xc9   :  { %1387 = vmatprep.subr.bf16.mxu0 %v2326_v61  ;;  %1428 = vmatprep.subr.bf16.mxu1 %v2329_v62  ;;  %v1455_v62 = vrot.slane %v1450_v52, %v1454_v53 }
  0xcc   :  { %1388 = vmatpush1.bf16.msra.mxu0 %v2324_v63  ;;  %1429 = vmatpush1.bf16.msra.mxu1 %v2327_v0  ;;  %v1463_v0 = vrot.slane %v1450_v52, %v1462_v54 }
  0xcd   :  { %1389 = vmatprep.subr.bf16.mxu0 %v2332_v1  ;;  %1430 = vmatprep.subr.bf16.mxu1 %v2335_v2 }
  0xd0   :  { %1390 = vmatpush1.bf16.msra.mxu0 %v2330_v3  ;;  %1431 = vmatpush1.bf16.msra.mxu1 %v2333_v5 }
  0xd1   :  { %2021 = vmatprep.subr.bf16.mxu1 %v2391_v9  ;;  %1990 = vmatprep.subr.bf16.mxu0 %v2336_v6 }
  0xd3   :  { %1392 = vmatmul.mubr.bf16.vlgmr.msra.gmra.mrb[8].mxu0 %v2442_v4  ;;  %1433 = vmatmul.mubr.bf16.vlgmr.msra.gmra.mrb[8].mxu1 %v2442_v4  ;;  %v2341_v4 = vld [vmem:[%s2547_s3 + $0x88] sm:$0xff]  }
  0xd4   :  { %2022 = vmatpush3.bf16.msra.mxu1 %v2338_v8  ;;  %1991 = vmatpush3.bf16.msra.mxu0 %v2337_v7 }
  0xd5   :  { %2023 = vmatprep.subr.bf16.mxu1 %v2391_v9  ;;  %1992 = vmatprep.subr.bf16.mxu0 %v2339_v10 }
  0xd6   :  { %2037 = vmatprep.mubr.msk.bf16.mxu1 %vm2392_vm0, %v2391_v9 }
  0xd8   :  { %2024 = vmatpush3.bf16.msra.mxu1 %v2341_v4  ;;  %1993 = vmatpush3.bf16.msra.mxu0 %v2340_v11 }
  0xd9   :  { %2025 = vmatprep.subr.bf16.mxu1 %v2391_v9  ;;  %1994 = vmatprep.subr.bf16.mxu0 %v2342_v12 }
  0xdc   :  { %2026 = vmatpush3.bf16.msra.mxu1 %v2344_v13  ;;  %1995 = vmatpush3.bf16.msra.mxu0 %v2343_v14 }
  0xdd   :  { %2027 = vmatprep.subr.bf16.mxu1 %v2391_v9  ;;  %1996 = vmatprep.subr.bf16.mxu0 %v2345_v15 }
  0xe0   :  { %2028 = vmatpush3.bf16.msra.mxu1 %v2347_v16  ;;  %1997 = vmatpush3.bf16.msra.mxu0 %v2346_v17 }
  0xe1   :  { %2029 = vmatprep.subr.bf16.mxu1 %v2391_v9  ;;  %1998 = vmatprep.subr.bf16.mxu0 %v2348_v18 }
  0xe4   :  { %2030 = vmatpush3.bf16.msra.mxu1 %v2350_v19  ;;  %1999 = vmatpush3.bf16.msra.mxu0 %v2349_v20  ;;  %v1965_v19 = vld [vmem:[%s2548_s4] ss:$0 sm:$0xff] }
  0xe5   :  { %2031 = vmatprep.subr.bf16.mxu1 %v2391_v9  ;;  %2000 = vmatprep.subr.bf16.mxu0 %v2351_v21 }
  0xe8   :  { %2001 = vmatpush3.bf16.msra.mxu0 %v2352_v22  ;;  %2032 = vmatpush3.bf16.msra.mxu1 %v2353_v23 }
  0xe9   :  { %2033 = vmatprep.subr.bf16.mxu1 %v2391_v9  ;;  %2002 = vmatprep.subr.bf16.mxu0 %v2354_v32 }
  0xec   :  { %2034 = vmatpush3.bf16.msra.mxu1 %v2356_v34  ;;  %2003 = vmatpush3.bf16.msra.mxu0 %v2355_v33 }
  0xed   :  { %2035 = vmatprep.subr.bf16.mxu1 %v2391_v9  ;;  %2004 = vmatprep.subr.bf16.mxu0 %v2357_v35 }
  0xf0   :  { %2036 = vmatpush3.bf16.msra.mxu1 %v2359_v37  ;;  %2005 = vmatpush3.bf16.msra.mxu0 %v2358_v36 }
 0x126   :  { %v1229_v24 = vpop.f32.mrb[0].mxu0  ;;  %v1270_v48 = vpop.f32.mrb[0].mxu1 }
 0x127   :  { %v1231_v25 = vpop.f32.mrb[1].mxu0  ;;  %v1272_v26 = vpop.f32.mrb[1].mxu1 }
 0x128   :  { %v1441_v27 = vmax.f32 %v1229_v24, %v1272_v26  ;;  %v1233_v28 = vpop.f32.mrb[2].mxu0  ;;  %v1274_v29 = vpop.f32.mrb[2].mxu1 }
 0x129   :  { %v1234_v30 = vpop.f32.mrb[3].mxu0  ;;  %v1275_v31 = vpop.f32.mrb[3].mxu1 }
 0x166   :  { %v1311_v38 = vpop.f32.mrb[4].mxu0  ;;  %v1352_v39 = vpop.f32.mrb[4].mxu1 }
 0x167   :  { %v1442_v40 = vmax.f32 %v1231_v25, %v1311_v38  ;;  %v1313_v41 = vpop.f32.mrb[5].mxu0  ;;  %v1354_v42 = vpop.f32.mrb[5].mxu1 }
 0x168   :  { %v1443_v43 = vmax.f32 %v1270_v48, %v1313_v41  ;;  %v1315_v44 = vpop.f32.mrb[6].mxu0  ;;  %v1356_v45 = vpop.f32.mrb[6].mxu1 }
 0x169   :  { %v1316_v46 = vpop.f32.mrb[7].mxu0  ;;  %v1357_v47 = vpop.f32.mrb[7].mxu1 }
 0x1a6   :  { %v1393_v55 = vpop.f32.mrb[8].mxu0  ;;  %v1434_v56 = vpop.f32.mrb[8].mxu1 }
 0x1a7   :  { %v1445_v57 = vmax.f32 %v1354_v42, %v1434_v56  ;;  %v1395_v59 = vpop.f32.mrb[9].mxu0  ;;  %v1436_v60 = vpop.f32.mrb[9].mxu1 }
 0x1a8   :  { %v1444_v61 = vmax.f32 %v1352_v39, %v1395_v59  ;;  %v1446_v63 = vmax.f32 %v1393_v55, %v1436_v60  ;;  %v1397_v1 = vpop.f32.mrb[10].mxu0  ;;  %v1438_v2 = vpop.f32.mrb[10].mxu1 }
 0x1a9   :  { %v1448_v3 = vmax.f32 %v1442_v40, %v1445_v57  ;;  %v1398_v5 = vpop.f32.mrb[11].mxu0  ;;  %v1439_v6 = vpop.f32.mrb[11].mxu1 }
 0x1aa   :  { %v1447_v7 = vmax.f32 %v1441_v27, %v1444_v61  ;;  %v1449_v8 = vmax.f32 %v1443_v43, %v1446_v63 }
 0x1ab   :  { %v1468_v9 = vadd.f32 %v1459_v58, %v1448_v3 }
 0x1ac   :  { %v1467_v10 = vadd.f32 %v1455_v62, %v1447_v7  ;;  %v1469_v4 = vadd.f32 %v1463_v0, %v1449_v8 }
 0x1ad   :  { %v1471_v11 = vmax.f32 %v1468_v9, 0.0 }
 0x1ae   :  { %v1470_v12 = vmax.f32 %v1467_v10, 0.0  ;;  %v1472_v13 = vmax.f32 %v1469_v4, 0.0 }
 0x1af   :  { %v1474_v14 = vpack.c.bf16 %v1471_v11, %v1471_v11 }
 0x1b0   :  { %v1473_v15 = vpack.c.bf16 %v1470_v12, %v1470_v12  ;;  %v1475_v16 = vpack.c.bf16 %v1472_v13, %v1472_v13 }
 0x1b1   :  { %1707 = vmatprep.mubr.bf16.mxu0 %v1474_v14 }
 0x1b2   :  { %1708 = vmatmul.mubr.bf16.vlgmr.msra.gmra.mrb[12].mxu0 %v1473_v15  ;;  %2038 = vmatmul.mubr.bf16.vlgmr.msra.gmra.mrb[12].mxu1 %v1475_v16 }
 0x285   :  { %v2006_v17 = vpop.f32.mrb[12].mxu0  ;;  %v1749_v18 = vpop.f32.mrb[12].mxu1 }
 0x286   :  { %v2007_v20 = vpop.f32.mrb[13].mxu0  ;;  %v2039_v21 = vpop.f32.mrb[13].mxu1 }
 0x287   :  { %v2008_v22 = vadd.f32 %v2007_v20, %v2006_v17  ;;  %v2009_v23 = vpop.f32.mrb[14].mxu0  ;;  %v1752_v24 = vpop.f32.mrb[14].mxu1 }
 0x288   :  { %v2010_v48 = vpop.f32.mrb[15].mxu0  ;;  %v2040_v25 = vpop.f32.mrb[15].mxu1 }
 0x289   :  { %v1710_v26 = vadd.f32 %v2008_v22, %v1965_v19 }
 0x28b   :  { %v1750_v27 = vadd.f32 %v1749_v18, %v1710_v26 }
 0x28d   :  { %1755 = vmax.xlane.f32.xlu0 %v1750_v27 }
 0x31a   :  { %v1756_v28 = vpop.xlane.xlu0 %1755 }
 0x31b   :  { %v1757_v29 = vsub.f32 %v1750_v27, %v1756_v28 }
 0x31d   :  { %v1758_v30 = vmul.f32 1.442695, %v1757_v29 }
 0x31f   :  { %2360 = vpow2.f32 %v1758_v30 }
 0x329   :  { %v2361_v31 = vpop.eup %2360 }
 0x32a   :  { %1760 = vadd.xlane.f32.xlu0 %v2361_v31 }
 0x3b7   :  { %v1761_v32 = vpop.xlane.xlu0 %1760 }
 0x3b8   :  { %2362 = vlog2.f32 %v1761_v32 }
 0x3c2   :  { %v2363_v33 = vpop.eup %2362 }
 0x3c3   :  { %v1763_v34 = vmul.f32 0.6931472, %v2363_v33 }
 0x3c5   :  { %v1764_v35 = vsub.f32 %v1757_v29, %v1763_v34 }
 0x3c7   :  { %1765 = vst [vmem:[%s2549_s5] sm:$0xff] %v1764_v35 }
 0x3c8   :  { %1770 = vsyncpa [#allocation3], 1 }

</bundles_post_ra>
